<compile_context>
chip_gen: v7x
topology: tpu7x:2x2x1
jax: 0.10.0
libtpu: 0.0.40
codegen_flags: <defaults>
</compile_context>

<pallas_src>
import jax
import jax.numpy as jnp
from jax import lax
from jax.experimental import pallas as pl
from jax.experimental.pallas import tpu as pltpu

# ---------------- small config ----------------
VOCAB = 100
HIDDEN = 32
N_HEADS = 4
HEAD_DIM = HIDDEN // N_HEADS
N_LAYERS = 2
MAX_POS = 64
FF = 4 * HIDDEN
IMG = 16
PATCH = 8
CHANNELS = 3
N_PATCHES = (IMG // PATCH) ** 2
PATCH_K = CHANNELS * PATCH * PATCH
LN_EPS = 1e-5

# packed-slab widths / offsets
WBIG_W = 3 * HIDDEN + HIDDEN + FF          # Wqkv | Wproj | Wfc   -> 256 lanes
SMALL_W = 9 * HIDDEN + FF                  # per-layer small params -> 416 lanes
# small-slab column layout per layer row:
#   ln1_g 0:32 | ln1_b 32:64 | bqkv 64:160 | bproj 160:192 |
#   ln2_g 192:224 | ln2_b 224:256 | bfc 256:384 | bfc2 384:416
# row N_LAYERS: lnf_g 0:32 | lnf_b 32:64 | zeros


# ---------------- shared math helpers (work in-kernel and in the reference) ----
def _gelu_new(x):
    # GPT2's "gelu_new" (tanh approximation)
    return 0.5 * x * (1.0 + jnp.tanh(
        jnp.sqrt(2.0 / jnp.pi) * (x + 0.044715 * x * x * x)))


def _layernorm(x, g, b):
    mu = jnp.mean(x, axis=-1, keepdims=True)
    var = jnp.mean(jnp.square(x - mu), axis=-1, keepdims=True)
    return (x - mu) * lax.rsqrt(var + LN_EPS) * g + b


# ---------------- the single fused Pallas kernel (one sequence per grid step) --
def fused_forward_kernel(emb_ref, patch_ref, convw_ref, wbig_ref, wfc2_ref,
                         small_ref, o_ref, x_ref, ctx_ref):
    S = emb_ref.shape[0]
    P = patch_ref.shape[0]

    # Fused patch projection: conv bias is already folded into emb's patch rows,
    # so only the [P,K]@[K,H] projection is added to rows [0, P).
    x_ref[...] = emb_ref[...]
    x_ref[0:P, :] = x_ref[0:P, :] + jnp.dot(
        patch_ref[...], convw_ref[...], preferred_element_type=jnp.float32)

    # In-kernel causal additive bias (per sequence) -- no HBM mask slab.
    rows = lax.broadcasted_iota(jnp.int32, (S, S), 0)
    cols = lax.broadcasted_iota(jnp.int32, (S, S), 1)
    neg_bias = jnp.where(cols <= rows, 0.0, -1e30).astype(jnp.float32)

    x = x_ref[...]
    for l in range(N_LAYERS):                     # static unroll (N_LAYERS = 2)
        # per-layer weight / bias views (static slices of VMEM-resident slabs)
        wqkv = wbig_ref[l, :, 0:3 * HIDDEN]                    # [H, 3H] (Q pre-scaled)
        wproj = wbig_ref[l, :, 3 * HIDDEN:4 * HIDDEN]          # [H, H]
        wfc = wbig_ref[l, :, 4 * HIDDEN:4 * HIDDEN + FF]       # [H, FF]
        wfc2 = wfc2_ref[l]                                     # [FF, H]
        ln1_g = small_ref[l:l + 1, 0:HIDDEN]
        ln1_b = small_ref[l:l + 1, HIDDEN:2 * HIDDEN]
        bqkv = small_ref[l:l + 1, 2 * HIDDEN:5 * HIDDEN]
        bproj = small_ref[l:l + 1, 5 * HIDDEN:6 * HIDDEN]
        ln2_g = small_ref[l:l + 1, 6 * HIDDEN:7 * HIDDEN]
        ln2_b = small_ref[l:l + 1, 7 * HIDDEN:8 * HIDDEN]
        bfc = small_ref[l:l + 1, 8 * HIDDEN:8 * HIDDEN + FF]
        bfc2 = small_ref[l:l + 1, 8 * HIDDEN + FF:9 * HIDDEN + FF]

        # ---- causal multi-head self-attention ----
        h = _layernorm(x, ln1_g, ln1_b)
        qkv = jnp.dot(h, wqkv, preferred_element_type=jnp.float32) + bqkv
        for hh in range(N_HEADS):                 # static unroll (N_HEADS = 4)
            s0 = hh * HEAD_DIM
            qh = qkv[:, s0:s0 + HEAD_DIM]
            kh = qkv[:, HIDDEN + s0:HIDDEN + s0 + HEAD_DIM]
            vh = qkv[:, 2 * HIDDEN + s0:2 * HIDDEN + s0 + HEAD_DIM]
            # scale already folded into Wq / bq -> no "* scale" on the scores
            s = jnp.einsum('qd,kd->qk', qh, kh,
                           preferred_element_type=jnp.float32) + neg_bias
            s = s - jnp.max(s, axis=-1, keepdims=True)
            p = jnp.exp(s)
            p = p / jnp.sum(p, axis=-1, keepdims=True)           # exact division
            # write this head's context into its contiguous 8-lane slice
            ctx_ref[:, s0:s0 + HEAD_DIM] = jnp.dot(
                p, vh, preferred_element_type=jnp.float32)
        # single K=HIDDEN output projection over all heads
        x = x + jnp.dot(ctx_ref[...], wproj,
                        preferred_element_type=jnp.float32) + bproj

        # ---- MLP ----
        h2 = _layernorm(x, ln2_g, ln2_b)
        ff = _gelu_new(jnp.dot(h2, wfc, preferred_element_type=jnp.float32) + bfc)
        x = x + jnp.dot(ff, wfc2, preferred_element_type=jnp.float32) + bfc2

    # final LayerNorm (params live in row N_LAYERS of the small slab)
    lnf_g = small_ref[N_LAYERS:N_LAYERS + 1, 0:HIDDEN]
    lnf_b = small_ref[N_LAYERS:N_LAYERS + 1, HIDDEN:2 * HIDDEN]
    o_ref[...] = _layernorm(x, lnf_g, lnf_b)


# ---------------- wrapper: plain-JAX glue + one pallas_call ----------------
def dtrocr_forward(params, pixel_values, input_ids):
    B, C, Himg, Wimg = pixel_values.shape
    input_ids = input_ids.reshape(-1, input_ids.shape[-1])      # module's .view()
    T = input_ids.shape[-1]
    gh, gw = Himg // PATCH, Wimg // PATCH
    P = gh * gw
    S = P + T

    # -- patch extraction (layout plumbing, stays in XLA) --
    xp = pixel_values.reshape(B, C, gh, PATCH, gw, PATCH)
    xp = xp.transpose(0, 2, 4, 1, 3, 5).reshape(B, P, PATCH_K).astype(jnp.float32)

    conv_w = params['conv_w'].reshape(HIDDEN, PATCH_K).T.astype(jnp.float32)  # [K, H]
    conv_b = params['conv_b'].reshape(1, HIDDEN).astype(jnp.float32)

    # -- embedding slab (gathers stay in XLA); conv bias folded into patch rows --
    pos = params['wpe'][:S]                                                   # [S, H]
    patch_part = jnp.broadcast_to(pos[:P] + conv_b, (B, P, HIDDEN))
    token_part = jnp.take(params['wte'], input_ids, axis=0) + pos[P:]         # [B, T, H]
    emb = jnp.concatenate([patch_part, token_part], axis=1)                   # [B, S, H]

    # -- fold the attention scale 1/sqrt(HEAD_DIM) into the Q weights / bias --
    scale = jnp.float32(1.0 / HEAD_DIM ** 0.5)
    qkv_scale = jnp.concatenate([jnp.full((HIDDEN,), scale, jnp.float32),
                                 jnp.ones((2 * HIDDEN,), jnp.float32)])

    layers = params['layers']
    wqkv = jnp.stack([lp['wqkv'] for lp in layers]) * qkv_scale   # [L, H, 3H]
    wproj = jnp.stack([lp['wproj'] for lp in layers])             # [L, H, H]
    wfc = jnp.stack([lp['wfc'] for lp in layers])                 # [L, H, FF]
    wbig = jnp.concatenate([wqkv, wproj, wfc], axis=-1)           # [L, H, 256]
    wfc2 = jnp.stack([lp['wfc2'] for lp in layers])               # [L, FF, H]

    def small_row(lp):
        return jnp.concatenate([
            lp['ln1_g'][0], lp['ln1_b'][0],
            lp['bqkv'][0] * qkv_scale, lp['bproj'][0],
            lp['ln2_g'][0], lp['ln2_b'][0],
            lp['bfc'][0], lp['bfc2'][0]])                          # [416]
    small = jnp.stack([small_row(lp) for lp in layers])            # [L, 416]
    final_row = jnp.concatenate([
        params['lnf_g'], params['lnf_b'],
        jnp.zeros((SMALL_W - 2 * HIDDEN,), jnp.float32)])
    small = jnp.concatenate([small, final_row[None]], axis=0)      # [L+1, 416]

    out = pl.pallas_call(
        fused_forward_kernel,
        out_shape=jax.ShapeDtypeStruct((B, S, HIDDEN), jnp.float32),
        grid=(B,),
        in_specs=[
            pl.BlockSpec((None, S, HIDDEN), lambda b: (b, 0, 0)),          # emb
            pl.BlockSpec((None, P, PATCH_K), lambda b: (b, 0, 0)),         # patches
            pl.BlockSpec((PATCH_K, HIDDEN), lambda b: (0, 0)),             # conv_w
            pl.BlockSpec((N_LAYERS, HIDDEN, WBIG_W), lambda b: (0, 0, 0)),  # Wqkv|Wproj|Wfc
            pl.BlockSpec((N_LAYERS, FF, HIDDEN), lambda b: (0, 0, 0)),     # Wfc2
            pl.BlockSpec((N_LAYERS + 1, SMALL_W), lambda b: (0, 0)),       # small params
        ],
        out_specs=pl.BlockSpec((None, S, HIDDEN), lambda b: (b, 0, 0)),
        scratch_shapes=[pltpu.VMEM((S, HIDDEN), jnp.float32),   # x working buffer
                        pltpu.VMEM((S, HIDDEN), jnp.float32)],  # per-head ctx buffer
        compiler_params=pltpu.CompilerParams(
            dimension_semantics=("parallel",),
            vmem_limit_bytes=32 * 1024 * 1024),
    )(emb, xp, conv_w, wbig, wfc2, small)
    return out   # DTrOCRModelOutput.hidden_states; past_key_values = None


# ---------------- pure-JAX reference (for a correctness sanity check) --------
def dtrocr_forward_ref(params, pixel_values, input_ids):
    B, C, Himg, Wimg = pixel_values.shape
    gh, gw = Himg // PATCH, Wimg // PATCH
    P = gh * gw
    T = input_ids.shape[-1]
    xp = pixel_values.reshape(B, C, gh, PATCH, gw, PATCH)
    xp = xp.transpose(0, 2, 4, 1, 3, 5).reshape(B, P, PATCH_K)
    w = params['conv_w'].reshape(HIDDEN, PATCH_K).T
    patch_emb = xp @ w + params['conv_b']
    tok_emb = jnp.take(params['wte'], input_ids, axis=0)
    x = jnp.concatenate([patch_emb, tok_emb], axis=1)
    S = x.shape[1]
    x = x + params['wpe'][:S][None]
    causal = jnp.tril(jnp.ones((S, S), bool))
    scale = 1.0 / jnp.sqrt(jnp.float32(HEAD_DIM))
    for lp in params['layers']:
        h = _layernorm(x, lp['ln1_g'], lp['ln1_b'])
        qkv = h @ lp['wqkv'] + lp['bqkv']
        q, k, v = jnp.split(qkv, 3, axis=-1)
        q = q.reshape(B, S, N_HEADS, HEAD_DIM).transpose(0, 2, 1, 3)
        k = k.reshape(B, S, N_HEADS, HEAD_DIM).transpose(0, 2, 1, 3)
        v = v.reshape(B, S, N_HEADS, HEAD_DIM).transpose(0, 2, 1, 3)
        s = jnp.einsum('bhqd,bhkd->bhqk', q, k) * scale
        s = jnp.where(causal, s, -1e30)
        p = jax.nn.softmax(s, axis=-1)
        ctx = jnp.einsum('bhqk,bhkd->bhqd', p, v)
        ctx = ctx.transpose(0, 2, 1, 3).reshape(B, S, HIDDEN)
        x = x + ctx @ lp['wproj'] + lp['bproj']
        h2 = _layernorm(x, lp['ln2_g'], lp['ln2_b'])
        ff = _gelu_new(h2 @ lp['wfc'] + lp['bfc'])
        x = x + ff @ lp['wfc2'] + lp['bfc2']
    return _layernorm(x, params['lnf_g'], params['lnf_b'])


# ---------------- parameters ----------------
def init_params(key):
    std = 0.02
    keys = jax.random.split(key, 4 + 4 * N_LAYERS)
    ki = iter(range(len(keys)))
    params = {
        'conv_w': std * jax.random.normal(
            keys[next(ki)], (HIDDEN, CHANNELS, PATCH, PATCH), jnp.float32),
        'conv_b': jnp.zeros((HIDDEN,), jnp.float32),
        'wte': std * jax.random.normal(keys[next(ki)], (VOCAB, HIDDEN), jnp.float32),
        'wpe': std * jax.random.normal(keys[next(ki)], (MAX_POS, HIDDEN), jnp.float32),
        'lnf_g': jnp.ones((HIDDEN,), jnp.float32),
        'lnf_b': jnp.zeros((HIDDEN,), jnp.float32),
        'layers': [],
    }
    for _ in range(N_LAYERS):
        layer = {
            'ln1_g': jnp.ones((1, HIDDEN), jnp.float32),
            'ln1_b': jnp.zeros((1, HIDDEN), jnp.float32),
            'wqkv': std * jax.random.normal(keys[next(ki)], (HIDDEN, 3 * HIDDEN), jnp.float32),
            'bqkv': jnp.zeros((1, 3 * HIDDEN), jnp.float32),
            'wproj': std * jax.random.normal(keys[next(ki)], (HIDDEN, HIDDEN), jnp.float32),
            'bproj': jnp.zeros((1, HIDDEN), jnp.float32),
            'ln2_g': jnp.ones((1, HIDDEN), jnp.float32),
            'ln2_b': jnp.zeros((1, HIDDEN), jnp.float32),
            'wfc': std * jax.random.normal(keys[next(ki)], (HIDDEN, FF), jnp.float32),
            'bfc': jnp.zeros((1, FF), jnp.float32),
            'wfc2': std * jax.random.normal(keys[next(ki)], (FF, HIDDEN), jnp.float32),
            'bfc2': jnp.zeros((1, HIDDEN), jnp.float32),
        }
        params['layers'].append(layer)
    return params


if __name__ == "__main__":
    key = jax.random.PRNGKey(0)
    k_params, k_px, k_ids = jax.random.split(key, 3)

    params = init_params(k_params)

    B, T = 2, 8
    pixel_values = jax.random.normal(k_px, (B, CHANNELS, IMG, IMG), jnp.float32)
    input_ids = jax.random.randint(k_ids, (B, T), 0, VOCAB, jnp.int32)

    fwd = jax.jit(dtrocr_forward)
    out = fwd(params, pixel_values, input_ids)
    jax.block_until_ready(out)

    assert out.shape == (B, N_PATCHES + T, HIDDEN), out.shape
    assert bool(jnp.all(jnp.isfinite(out)))

    # sanity check against the pure-JAX reference (exact softmax division now;
    # remaining diff is default MXU matmul precision)
    ref = dtrocr_forward_ref(params, pixel_values, input_ids)
    max_err = float(jnp.max(jnp.abs(out - ref)))
    assert max_err < 2e-2, f"max abs diff vs reference: {max_err}"

    print("KERNEL_OK")
</pallas_src>

<mosaic_0001>
module attributes {stable_mosaic.version = 11 : i64} {
  func.func @fused_forward_kernel(%arg0: i32, %arg1: memref<1x12x32xf32, #tpu.memory_space<vmem>>, %arg2: memref<1x4x192xf32, #tpu.memory_space<vmem>>, %arg3: memref<192x32xf32, #tpu.memory_space<vmem>>, %arg4: memref<2x32x256xf32, #tpu.memory_space<vmem>>, %arg5: memref<2x128x32xf32, #tpu.memory_space<vmem>>, %arg6: memref<3x416xf32, #tpu.memory_space<vmem>>, %arg7: memref<1x12x32xf32, #tpu.memory_space<vmem>>, %arg8: memref<12x32xf32, #tpu.memory_space<vmem>>, %arg9: memref<12x32xf32, #tpu.memory_space<vmem>>) attributes {dimension_semantics = [#tpu.dimension_semantics<parallel>], iteration_bounds = array<i64: 2>, scalar_prefetch = 0 : i64, scratch_operands = 2 : i64, tpu.core_type = #tpu.core_type<tc>, window_params = [{transform_indices = @transform_0, window_bounds = array<i64: 1, 12, 32>}, {transform_indices = @transform_1, window_bounds = array<i64: 1, 4, 192>}, {pipeline_mode = #tpu.pipeline_mode<synchronous>, transform_indices = @transform_2, window_bounds = array<i64: 192, 32>}, {pipeline_mode = #tpu.pipeline_mode<synchronous>, transform_indices = @transform_3, window_bounds = array<i64: 2, 32, 256>}, {pipeline_mode = #tpu.pipeline_mode<synchronous>, transform_indices = @transform_4, window_bounds = array<i64: 2, 128, 32>}, {pipeline_mode = #tpu.pipeline_mode<synchronous>, transform_indices = @transform_5, window_bounds = array<i64: 3, 416>}, {transform_indices = @transform_6, window_bounds = array<i64: 1, 12, 32>}]} {
    %c0 = arith.constant 0 : index
    %c0_0 = arith.constant 0 : index
    %c0_1 = arith.constant 0 : index
    %0 = vector.load %arg1[%c0, %c0_0, %c0_1] : memref<1x12x32xf32, #tpu.memory_space<vmem>>, vector<1x12x32xf32>
    %1 = vector.shape_cast %0 : vector<1x12x32xf32> to vector<12x32xf32>
    %c0_2 = arith.constant 0 : index
    %c0_3 = arith.constant 0 : index
    %2 = vector.load %arg8[%c0_2, %c0_3] : memref<12x32xf32, #tpu.memory_space<vmem>>, vector<12x32xf32>
    tpu.vector_store %arg8[%c0_2, %c0_3], %1 {strides = array<i32>} : memref<12x32xf32, #tpu.memory_space<vmem>>, vector<12x32xf32>,
    %c0_4 = arith.constant 0 : index
    %c0_5 = arith.constant 0 : index
    %3 = vector.load %arg8[%c0_4, %c0_5] : memref<12x32xf32, #tpu.memory_space<vmem>>, vector<4x32xf32>
    %c0_6 = arith.constant 0 : index
    %c0_7 = arith.constant 0 : index
    %c0_8 = arith.constant 0 : index
    %4 = vector.load %arg2[%c0_6, %c0_7, %c0_8] : memref<1x4x192xf32, #tpu.memory_space<vmem>>, vector<1x4x192xf32>
    %5 = vector.shape_cast %4 : vector<1x4x192xf32> to vector<4x192xf32>
    %c0_9 = arith.constant 0 : index
    %c0_10 = arith.constant 0 : index
    %6 = vector.load %arg3[%c0_9, %c0_10] : memref<192x32xf32, #tpu.memory_space<vmem>>, vector<192x32xf32>
    %cst = arith.constant dense<0.000000e+00> : vector<4x32xf32>
    %7 = tpu.matmul %5, %6, %cst {dimension_numbers = #tpu.dot_dimension_numbers<[1], [0], [0], [1], [0, 0, 1, 1], [], []>} : vector<4x192xf32>, vector<192x32xf32>, vector<4x32xf32> -> vector<4x32xf32>
    %8 = arith.addf %3, %7 : vector<4x32xf32>
    %c0_11 = arith.constant 0 : index
    %c0_12 = arith.constant 0 : index
    %9 = vector.load %arg8[%c0_11, %c0_12] : memref<12x32xf32, #tpu.memory_space<vmem>>, vector<4x32xf32>
    tpu.vector_store %arg8[%c0_11, %c0_12], %8 {strides = array<i32>} : memref<12x32xf32, #tpu.memory_space<vmem>>, vector<4x32xf32>,
    %10 = tpu.iota {dimensions = array<i32: 0>} : vector<12x12xi32>
    %11 = tpu.iota {dimensions = array<i32: 1>} : vector<12x12xi32>
    %12 = arith.cmpi sle, %11, %10 : vector<12x12xi32>
    %cst_13 = arith.constant 0.000000e+00 : f32
    %cst_14 = arith.constant -1.000000e+30 : f32
    %13 = vector.broadcast %cst_13 : f32 to vector<12x12xf32>
    %14 = vector.broadcast %cst_14 : f32 to vector<12x12xf32>
    %15 = arith.select %12, %13, %14 : vector<12x12xi1>, vector<12x12xf32>
    %c0_15 = arith.constant 0 : index
    %c0_16 = arith.constant 0 : index
    %16 = vector.load %arg8[%c0_15, %c0_16] : memref<12x32xf32, #tpu.memory_space<vmem>>, vector<12x32xf32>
    %c0_17 = arith.constant 0 : index
    %c0_18 = arith.constant 0 : index
    %c0_19 = arith.constant 0 : index
    %17 = vector.load %arg4[%c0_17, %c0_18, %c0_19] : memref<2x32x256xf32, #tpu.memory_space<vmem>>, vector<1x32x96xf32>
    %18 = vector.shape_cast %17 : vector<1x32x96xf32> to vector<32x96xf32>
    %c0_20 = arith.constant 0 : index
    %c0_21 = arith.constant 0 : index
    %c96 = arith.constant 96 : index
    %19 = vector.load %arg4[%c0_20, %c0_21, %c96] : memref<2x32x256xf32, #tpu.memory_space<vmem>>, vector<1x32x32xf32>
    %20 = vector.shape_cast %19 : vector<1x32x32xf32> to vector<32x32xf32>
    %c0_22 = arith.constant 0 : index
    %c0_23 = arith.constant 0 : index
    %c128 = arith.constant 128 : index
    %21 = vector.load %arg4[%c0_22, %c0_23, %c128] : memref<2x32x256xf32, #tpu.memory_space<vmem>>, vector<1x32x128xf32>
    %22 = vector.shape_cast %21 : vector<1x32x128xf32> to vector<32x128xf32>
    %c0_24 = arith.constant 0 : index
    %c0_25 = arith.constant 0 : index
    %c0_26 = arith.constant 0 : index
    %23 = vector.load %arg5[%c0_24, %c0_25, %c0_26] : memref<2x128x32xf32, #tpu.memory_space<vmem>>, vector<1x128x32xf32>
    %24 = vector.shape_cast %23 : vector<1x128x32xf32> to vector<128x32xf32>
    %c0_27 = arith.constant 0 : index
    %c0_28 = arith.constant 0 : index
    %25 = vector.load %arg6[%c0_27, %c0_28] : memref<3x416xf32, #tpu.memory_space<vmem>>, vector<1x32xf32>
    %c0_29 = arith.constant 0 : index
    %c32 = arith.constant 32 : index
    %26 = vector.load %arg6[%c0_29, %c32] : memref<3x416xf32, #tpu.memory_space<vmem>>, vector<1x32xf32>
    %c0_30 = arith.constant 0 : index
    %c64 = arith.constant 64 : index
    %27 = vector.load %arg6[%c0_30, %c64] : memref<3x416xf32, #tpu.memory_space<vmem>>, vector<1x96xf32>
    %c0_31 = arith.constant 0 : index
    %c160 = arith.constant 160 : index
    %28 = vector.load %arg6[%c0_31, %c160] : memref<3x416xf32, #tpu.memory_space<vmem>>, vector<1x32xf32>
    %c0_32 = arith.constant 0 : index
    %c192 = arith.constant 192 : index
    %29 = vector.load %arg6[%c0_32, %c192] : memref<3x416xf32, #tpu.memory_space<vmem>>, vector<1x32xf32>
    %c0_33 = arith.constant 0 : index
    %c224 = arith.constant 224 : index
    %30 = vector.load %arg6[%c0_33, %c224] : memref<3x416xf32, #tpu.memory_space<vmem>>, vector<1x32xf32>
    %c0_34 = arith.constant 0 : index
    %c256 = arith.constant 256 : index
    %31 = vector.load %arg6[%c0_34, %c256] : memref<3x416xf32, #tpu.memory_space<vmem>>, vector<1x128xf32>
    %c0_35 = arith.constant 0 : index
    %c384 = arith.constant 384 : index
    %32 = vector.load %arg6[%c0_35, %c384] : memref<3x416xf32, #tpu.memory_space<vmem>>, vector<1x32xf32>
    %cst_36 = arith.constant dense<0.000000e+00> : vector<12xf32>
    %33 = vector.multi_reduction <add>, %16, %cst_36 [1] : vector<12x32xf32> to vector<12xf32>
    %34 = vector.shape_cast %33 : vector<12xf32> to vector<12x1xf32>
    %cst_37 = arith.constant 3.200000e+01 : f32
    %35 = vector.broadcast %cst_37 : f32 to vector<12x1xf32>
    %36 = arith.divf %34, %35 : vector<12x1xf32>
    %37 = vector.broadcast %36 : vector<12x1xf32> to vector<12x32xf32>
    %38 = arith.subf %16, %37 : vector<12x32xf32>
    %39 = arith.mulf %38, %38 : vector<12x32xf32>
    %cst_38 = arith.constant dense<0.000000e+00> : vector<12xf32>
    %40 = vector.multi_reduction <add>, %39, %cst_38 [1] : vector<12x32xf32> to vector<12xf32>
    %41 = vector.shape_cast %40 : vector<12xf32> to vector<12x1xf32>
    %cst_39 = arith.constant 3.200000e+01 : f32
    %42 = vector.broadcast %cst_39 : f32 to vector<12x1xf32>
    %43 = arith.divf %41, %42 : vector<12x1xf32>
    %44 = vector.broadcast %36 : vector<12x1xf32> to vector<12x32xf32>
    %45 = arith.subf %16, %44 : vector<12x32xf32>
    %cst_40 = arith.constant 9.99999974E-6 : f32
    %46 = vector.broadcast %cst_40 : f32 to vector<12x1xf32>
    %47 = arith.addf %43, %46 : vector<12x1xf32>
    %48 = math.rsqrt %47 : vector<12x1xf32>
    %49 = vector.broadcast %48 : vector<12x1xf32> to vector<12x32xf32>
    %50 = arith.mulf %45, %49 : vector<12x32xf32>
    %51 = vector.broadcast %25 : vector<1x32xf32> to vector<12x32xf32>
    %52 = arith.mulf %50, %51 : vector<12x32xf32>
    %53 = vector.broadcast %26 : vector<1x32xf32> to vector<12x32xf32>
    %54 = arith.addf %52, %53 : vector<12x32xf32>
    %cst_41 = arith.constant dense<0.000000e+00> : vector<12x96xf32>
    %55 = tpu.matmul %54, %18, %cst_41 {dimension_numbers = #tpu.dot_dimension_numbers<[1], [0], [0], [1], [0, 0, 1, 1], [], []>} : vector<12x32xf32>, vector<32x96xf32>, vector<12x96xf32> -> vector<12x96xf32>
    %56 = vector.broadcast %27 : vector<1x96xf32> to vector<12x96xf32>
    %57 = arith.addf %55, %56 : vector<12x96xf32>
    %58 = vector.extract_strided_slice %57 {offsets = [0, 0], sizes = [12, 8], strides = [1, 1]} : vector<12x96xf32> to vector<12x8xf32>
    %59 = vector.extract_strided_slice %57 {offsets = [0, 32], sizes = [12, 8], strides = [1, 1]} : vector<12x96xf32> to vector<12x8xf32>
    %60 = vector.extract_strided_slice %57 {offsets = [0, 64], sizes = [12, 8], strides = [1, 1]} : vector<12x96xf32> to vector<12x8xf32>
    "tpu.trace_start"() <{level = 10 : i32, message = "qd,kd->qk"}> : () -> ()
    %cst_42 = arith.constant dense<0.000000e+00> : vector<12x12xf32>
    %61 = tpu.matmul %58, %59, %cst_42 {dimension_numbers = #tpu.dot_dimension_numbers<[1], [1], [0], [0], [0, 0, 1, 0], [], []>} : vector<12x8xf32>, vector<12x8xf32>, vector<12x12xf32> -> vector<12x12xf32>
    "tpu.trace_stop"() : () -> ()
    %62 = arith.addf %61, %15 : vector<12x12xf32>
    %cst_43 = arith.constant dense<0xFF800000> : vector<12xf32>
    %63 = vector.multi_reduction <maximumf>, %62, %cst_43 [1] : vector<12x12xf32> to vector<12xf32>
    %64 = vector.shape_cast %63 : vector<12xf32> to vector<12x1xf32>
    %65 = vector.broadcast %64 : vector<12x1xf32> to vector<12x12xf32>
    %66 = arith.subf %62, %65 : vector<12x12xf32>
    %67 = math.exp %66 : vector<12x12xf32>
    %cst_44 = arith.constant dense<0.000000e+00> : vector<12xf32>
    %68 = vector.multi_reduction <add>, %67, %cst_44 [1] : vector<12x12xf32> to vector<12xf32>
    %69 = vector.shape_cast %68 : vector<12xf32> to vector<12x1xf32>
    %70 = vector.broadcast %69 : vector<12x1xf32> to vector<12x12xf32>
    %71 = arith.divf %67, %70 : vector<12x12xf32>
    %cst_45 = arith.constant dense<0.000000e+00> : vector<12x8xf32>
    %72 = tpu.matmul %71, %60, %cst_45 {dimension_numbers = #tpu.dot_dimension_numbers<[1], [0], [0], [1], [0, 0, 1, 1], [], []>} : vector<12x12xf32>, vector<12x8xf32>, vector<12x8xf32> -> vector<12x8xf32>
    %c0_46 = arith.constant 0 : index
    %c0_47 = arith.constant 0 : index
    %73 = vector.load %arg9[%c0_46, %c0_47] : memref<12x32xf32, #tpu.memory_space<vmem>>, vector<12x8xf32>
    tpu.vector_store %arg9[%c0_46, %c0_47], %72 {strides = array<i32>} : memref<12x32xf32, #tpu.memory_space<vmem>>, vector<12x8xf32>,
    %74 = vector.extract_strided_slice %57 {offsets = [0, 8], sizes = [12, 8], strides = [1, 1]} : vector<12x96xf32> to vector<12x8xf32>
    %75 = vector.extract_strided_slice %57 {offsets = [0, 40], sizes = [12, 8], strides = [1, 1]} : vector<12x96xf32> to vector<12x8xf32>
    %76 = vector.extract_strided_slice %57 {offsets = [0, 72], sizes = [12, 8], strides = [1, 1]} : vector<12x96xf32> to vector<12x8xf32>
    "tpu.trace_start"() <{level = 10 : i32, message = "qd,kd->qk"}> : () -> ()
    %cst_48 = arith.constant dense<0.000000e+00> : vector<12x12xf32>
    %77 = tpu.matmul %74, %75, %cst_48 {dimension_numbers = #tpu.dot_dimension_numbers<[1], [1], [0], [0], [0, 0, 1, 0], [], []>} : vector<12x8xf32>, vector<12x8xf32>, vector<12x12xf32> -> vector<12x12xf32>
    "tpu.trace_stop"() : () -> ()
    %78 = arith.addf %77, %15 : vector<12x12xf32>
    %cst_49 = arith.constant dense<0xFF800000> : vector<12xf32>
    %79 = vector.multi_reduction <maximumf>, %78, %cst_49 [1] : vector<12x12xf32> to vector<12xf32>
    %80 = vector.shape_cast %79 : vector<12xf32> to vector<12x1xf32>
    %81 = vector.broadcast %80 : vector<12x1xf32> to vector<12x12xf32>
    %82 = arith.subf %78, %81 : vector<12x12xf32>
    %83 = math.exp %82 : vector<12x12xf32>
    %cst_50 = arith.constant dense<0.000000e+00> : vector<12xf32>
    %84 = vector.multi_reduction <add>, %83, %cst_50 [1] : vector<12x12xf32> to vector<12xf32>
    %85 = vector.shape_cast %84 : vector<12xf32> to vector<12x1xf32>
    %86 = vector.broadcast %85 : vector<12x1xf32> to vector<12x12xf32>
    %87 = arith.divf %83, %86 : vector<12x12xf32>
    %cst_51 = arith.constant dense<0.000000e+00> : vector<12x8xf32>
    %88 = tpu.matmul %87, %76, %cst_51 {dimension_numbers = #tpu.dot_dimension_numbers<[1], [0], [0], [1], [0, 0, 1, 1], [], []>} : vector<12x12xf32>, vector<12x8xf32>, vector<12x8xf32> -> vector<12x8xf32>
    %c0_52 = arith.constant 0 : index
    %c8 = arith.constant 8 : index
    %89 = vector.load %arg9[%c0_52, %c8] : memref<12x32xf32, #tpu.memory_space<vmem>>, vector<12x8xf32>
    tpu.vector_store %arg9[%c0_52, %c8], %88 {strides = array<i32>} : memref<12x32xf32, #tpu.memory_space<vmem>>, vector<12x8xf32>,
    %90 = vector.extract_strided_slice %57 {offsets = [0, 16], sizes = [12, 8], strides = [1, 1]} : vector<12x96xf32> to vector<12x8xf32>
    %91 = vector.extract_strided_slice %57 {offsets = [0, 48], sizes = [12, 8], strides = [1, 1]} : vector<12x96xf32> to vector<12x8xf32>
    %92 = vector.extract_strided_slice %57 {offsets = [0, 80], sizes = [12, 8], strides = [1, 1]} : vector<12x96xf32> to vector<12x8xf32>
    "tpu.trace_start"() <{level = 10 : i32, message = "qd,kd->qk"}> : () -> ()
    %cst_53 = arith.constant dense<0.000000e+00> : vector<12x12xf32>
    %93 = tpu.matmul %90, %91, %cst_53 {dimension_numbers = #tpu.dot_dimension_numbers<[1], [1], [0], [0], [0, 0, 1, 0], [], []>} : vector<12x8xf32>, vector<12x8xf32>, vector<12x12xf32> -> vector<12x12xf32>
    "tpu.trace_stop"() : () -> ()
    %94 = arith.addf %93, %15 : vector<12x12xf32>
    %cst_54 = arith.constant dense<0xFF800000> : vector<12xf32>
    %95 = vector.multi_reduction <maximumf>, %94, %cst_54 [1] : vector<12x12xf32> to vector<12xf32>
    %96 = vector.shape_cast %95 : vector<12xf32> to vector<12x1xf32>
    %97 = vector.broadcast %96 : vector<12x1xf32> to vector<12x12xf32>
    %98 = arith.subf %94, %97 : vector<12x12xf32>
    %99 = math.exp %98 : vector<12x12xf32>
    %cst_55 = arith.constant dense<0.000000e+00> : vector<12xf32>
    %100 = vector.multi_reduction <add>, %99, %cst_55 [1] : vector<12x12xf32> to vector<12xf32>
    %101 = vector.shape_cast %100 : vector<12xf32> to vector<12x1xf32>
    %102 = vector.broadcast %101 : vector<12x1xf32> to vector<12x12xf32>
    %103 = arith.divf %99, %102 : vector<12x12xf32>
    %cst_56 = arith.constant dense<0.000000e+00> : vector<12x8xf32>
    %104 = tpu.matmul %103, %92, %cst_56 {dimension_numbers = #tpu.dot_dimension_numbers<[1], [0], [0], [1], [0, 0, 1, 1], [], []>} : vector<12x12xf32>, vector<12x8xf32>, vector<12x8xf32> -> vector<12x8xf32>
    %c0_57 = arith.constant 0 : index
    %c16 = arith.constant 16 : index
    %105 = vector.load %arg9[%c0_57, %c16] : memref<12x32xf32, #tpu.memory_space<vmem>>, vector<12x8xf32>
    tpu.vector_store %arg9[%c0_57, %c16], %104 {strides = array<i32>} : memref<12x32xf32, #tpu.memory_space<vmem>>, vector<12x8xf32>,
    %106 = vector.extract_strided_slice %57 {offsets = [0, 24], sizes = [12, 8], strides = [1, 1]} : vector<12x96xf32> to vector<12x8xf32>
    %107 = vector.extract_strided_slice %57 {offsets = [0, 56], sizes = [12, 8], strides = [1, 1]} : vector<12x96xf32> to vector<12x8xf32>
    %108 = vector.extract_strided_slice %57 {offsets = [0, 88], sizes = [12, 8], strides = [1, 1]} : vector<12x96xf32> to vector<12x8xf32>
    "tpu.trace_start"() <{level = 10 : i32, message = "qd,kd->qk"}> : () -> ()
    %cst_58 = arith.constant dense<0.000000e+00> : vector<12x12xf32>
    %109 = tpu.matmul %106, %107, %cst_58 {dimension_numbers = #tpu.dot_dimension_numbers<[1], [1], [0], [0], [0, 0, 1, 0], [], []>} : vector<12x8xf32>, vector<12x8xf32>, vector<12x12xf32> -> vector<12x12xf32>
    "tpu.trace_stop"() : () -> ()
    %110 = arith.addf %109, %15 : vector<12x12xf32>
    %cst_59 = arith.constant dense<0xFF800000> : vector<12xf32>
    %111 = vector.multi_reduction <maximumf>, %110, %cst_59 [1] : vector<12x12xf32> to vector<12xf32>
    %112 = vector.shape_cast %111 : vector<12xf32> to vector<12x1xf32>
    %113 = vector.broadcast %112 : vector<12x1xf32> to vector<12x12xf32>
    %114 = arith.subf %110, %113 : vector<12x12xf32>
    %115 = math.exp %114 : vector<12x12xf32>
    %cst_60 = arith.constant dense<0.000000e+00> : vector<12xf32>
    %116 = vector.multi_reduction <add>, %115, %cst_60 [1] : vector<12x12xf32> to vector<12xf32>
    %117 = vector.shape_cast %116 : vector<12xf32> to vector<12x1xf32>
    %118 = vector.broadcast %117 : vector<12x1xf32> to vector<12x12xf32>
    %119 = arith.divf %115, %118 : vector<12x12xf32>
    %cst_61 = arith.constant dense<0.000000e+00> : vector<12x8xf32>
    %120 = tpu.matmul %119, %108, %cst_61 {dimension_numbers = #tpu.dot_dimension_numbers<[1], [0], [0], [1], [0, 0, 1, 1], [], []>} : vector<12x12xf32>, vector<12x8xf32>, vector<12x8xf32> -> vector<12x8xf32>
    %c0_62 = arith.constant 0 : index
    %c24 = arith.constant 24 : index
    %121 = vector.load %arg9[%c0_62, %c24] : memref<12x32xf32, #tpu.memory_space<vmem>>, vector<12x8xf32>
    tpu.vector_store %arg9[%c0_62, %c24], %120 {strides = array<i32>} : memref<12x32xf32, #tpu.memory_space<vmem>>, vector<12x8xf32>,
    %c0_63 = arith.constant 0 : index
    %c0_64 = arith.constant 0 : index
    %122 = vector.load %arg9[%c0_63, %c0_64] : memref<12x32xf32, #tpu.memory_space<vmem>>, vector<12x32xf32>
    %cst_65 = arith.constant dense<0.000000e+00> : vector<12x32xf32>
    %123 = tpu.matmul %122, %20, %cst_65 {dimension_numbers = #tpu.dot_dimension_numbers<[1], [0], [0], [1], [0, 0, 1, 1], [], []>} : vector<12x32xf32>, vector<32x32xf32>, vector<12x32xf32> -> vector<12x32xf32>
    %124 = arith.addf %16, %123 : vector<12x32xf32>
    %125 = vector.broadcast %28 : vector<1x32xf32> to vector<12x32xf32>
    %126 = arith.addf %124, %125 : vector<12x32xf32>
    %cst_66 = arith.constant dense<0.000000e+00> : vector<12xf32>
    %127 = vector.multi_reduction <add>, %126, %cst_66 [1] : vector<12x32xf32> to vector<12xf32>
    %128 = vector.shape_cast %127 : vector<12xf32> to vector<12x1xf32>
    %cst_67 = arith.constant 3.200000e+01 : f32
    %129 = vector.broadcast %cst_67 : f32 to vector<12x1xf32>
    %130 = arith.divf %128, %129 : vector<12x1xf32>
    %131 = vector.broadcast %130 : vector<12x1xf32> to vector<12x32xf32>
    %132 = arith.subf %126, %131 : vector<12x32xf32>
    %133 = arith.mulf %132, %132 : vector<12x32xf32>
    %cst_68 = arith.constant dense<0.000000e+00> : vector<12xf32>
    %134 = vector.multi_reduction <add>, %133, %cst_68 [1] : vector<12x32xf32> to vector<12xf32>
    %135 = vector.shape_cast %134 : vector<12xf32> to vector<12x1xf32>
    %cst_69 = arith.constant 3.200000e+01 : f32
    %136 = vector.broadcast %cst_69 : f32 to vector<12x1xf32>
    %137 = arith.divf %135, %136 : vector<12x1xf32>
    %138 = vector.broadcast %130 : vector<12x1xf32> to vector<12x32xf32>
    %139 = arith.subf %126, %138 : vector<12x32xf32>
    %cst_70 = arith.constant 9.99999974E-6 : f32
    %140 = vector.broadcast %cst_70 : f32 to vector<12x1xf32>
    %141 = arith.addf %137, %140 : vector<12x1xf32>
    %142 = math.rsqrt %141 : vector<12x1xf32>
    %143 = vector.broadcast %142 : vector<12x1xf32> to vector<12x32xf32>
    %144 = arith.mulf %139, %143 : vector<12x32xf32>
    %145 = vector.broadcast %29 : vector<1x32xf32> to vector<12x32xf32>
    %146 = arith.mulf %144, %145 : vector<12x32xf32>
    %147 = vector.broadcast %30 : vector<1x32xf32> to vector<12x32xf32>
    %148 = arith.addf %146, %147 : vector<12x32xf32>
    %cst_71 = arith.constant dense<0.000000e+00> : vector<12x128xf32>
    %149 = tpu.matmul %148, %22, %cst_71 {dimension_numbers = #tpu.dot_dimension_numbers<[1], [0], [0], [1], [0, 0, 1, 1], [], []>} : vector<12x32xf32>, vector<32x128xf32>, vector<12x128xf32> -> vector<12x128xf32>
    %150 = vector.broadcast %31 : vector<1x128xf32> to vector<12x128xf32>
    %151 = arith.addf %149, %150 : vector<12x128xf32>
    %cst_72 = arith.constant 5.000000e-01 : f32
    %152 = vector.broadcast %cst_72 : f32 to vector<12x128xf32>
    %153 = arith.mulf %152, %151 : vector<12x128xf32>
    %cst_73 = arith.constant 0.636619746 : f32
    %154 = math.sqrt %cst_73 : f32
    %cst_74 = arith.constant 4.471500e-02 : f32
    %155 = vector.broadcast %cst_74 : f32 to vector<12x128xf32>
    %156 = arith.mulf %155, %151 : vector<12x128xf32>
    %157 = arith.mulf %156, %151 : vector<12x128xf32>
    %158 = arith.mulf %157, %151 : vector<12x128xf32>
    %159 = arith.addf %151, %158 : vector<12x128xf32>
    %160 = vector.broadcast %154 : f32 to vector<12x128xf32>
    %161 = arith.mulf %160, %159 : vector<12x128xf32>
    %162 = math.tanh %161 : vector<12x128xf32>
    %cst_75 = arith.constant 1.000000e+00 : f32
    %163 = vector.broadcast %cst_75 : f32 to vector<12x128xf32>
    %164 = arith.addf %163, %162 : vector<12x128xf32>
    %165 = arith.mulf %153, %164 : vector<12x128xf32>
    %cst_76 = arith.constant dense<0.000000e+00> : vector<12x32xf32>
    %166 = tpu.matmul %165, %24, %cst_76 {dimension_numbers = #tpu.dot_dimension_numbers<[1], [0], [0], [1], [0, 0, 1, 1], [], []>} : vector<12x128xf32>, vector<128x32xf32>, vector<12x32xf32> -> vector<12x32xf32>
    %167 = arith.addf %126, %166 : vector<12x32xf32>
    %168 = vector.broadcast %32 : vector<1x32xf32> to vector<12x32xf32>
    %169 = arith.addf %167, %168 : vector<12x32xf32>
    %c1 = arith.constant 1 : index
    %c0_77 = arith.constant 0 : index
    %c0_78 = arith.constant 0 : index
    %170 = vector.load %arg4[%c1, %c0_77, %c0_78] : memref<2x32x256xf32, #tpu.memory_space<vmem>>, vector<1x32x96xf32>
    %171 = vector.shape_cast %170 : vector<1x32x96xf32> to vector<32x96xf32>
    %c1_79 = arith.constant 1 : index
    %c0_80 = arith.constant 0 : index
    %c96_81 = arith.constant 96 : index
    %172 = vector.load %arg4[%c1_79, %c0_80, %c96_81] : memref<2x32x256xf32, #tpu.memory_space<vmem>>, vector<1x32x32xf32>
    %173 = vector.shape_cast %172 : vector<1x32x32xf32> to vector<32x32xf32>
    %c1_82 = arith.constant 1 : index
    %c0_83 = arith.constant 0 : index
    %c128_84 = arith.constant 128 : index
    %174 = vector.load %arg4[%c1_82, %c0_83, %c128_84] : memref<2x32x256xf32, #tpu.memory_space<vmem>>, vector<1x32x128xf32>
    %175 = vector.shape_cast %174 : vector<1x32x128xf32> to vector<32x128xf32>
    %c1_85 = arith.constant 1 : index
    %c0_86 = arith.constant 0 : index
    %c0_87 = arith.constant 0 : index
    %176 = vector.load %arg5[%c1_85, %c0_86, %c0_87] : memref<2x128x32xf32, #tpu.memory_space<vmem>>, vector<1x128x32xf32>
    %177 = vector.shape_cast %176 : vector<1x128x32xf32> to vector<128x32xf32>
    %c1_88 = arith.constant 1 : index
    %c0_89 = arith.constant 0 : index
    %178 = vector.load %arg6[%c1_88, %c0_89] : memref<3x416xf32, #tpu.memory_space<vmem>>, vector<1x32xf32>
    %c1_90 = arith.constant 1 : index
    %c32_91 = arith.constant 32 : index
    %179 = vector.load %arg6[%c1_90, %c32_91] : memref<3x416xf32, #tpu.memory_space<vmem>>, vector<1x32xf32>
    %c1_92 = arith.constant 1 : index
    %c64_93 = arith.constant 64 : index
    %180 = vector.load %arg6[%c1_92, %c64_93] : memref<3x416xf32, #tpu.memory_space<vmem>>, vector<1x96xf32>
    %c1_94 = arith.constant 1 : index
    %c160_95 = arith.constant 160 : index
    %181 = vector.load %arg6[%c1_94, %c160_95] : memref<3x416xf32, #tpu.memory_space<vmem>>, vector<1x32xf32>
    %c1_96 = arith.constant 1 : index
    %c192_97 = arith.constant 192 : index
    %182 = vector.load %arg6[%c1_96, %c192_97] : memref<3x416xf32, #tpu.memory_space<vmem>>, vector<1x32xf32>
    %c1_98 = arith.constant 1 : index
    %c224_99 = arith.constant 224 : index
    %183 = vector.load %arg6[%c1_98, %c224_99] : memref<3x416xf32, #tpu.memory_space<vmem>>, vector<1x32xf32>
    %c1_100 = arith.constant 1 : index
    %c256_101 = arith.constant 256 : index
    %184 = vector.load %arg6[%c1_100, %c256_101] : memref<3x416xf32, #tpu.memory_space<vmem>>, vector<1x128xf32>
    %c1_102 = arith.constant 1 : index
    %c384_103 = arith.constant 384 : index
    %185 = vector.load %arg6[%c1_102, %c384_103] : memref<3x416xf32, #tpu.memory_space<vmem>>, vector<1x32xf32>
    %cst_104 = arith.constant dense<0.000000e+00> : vector<12xf32>
    %186 = vector.multi_reduction <add>, %169, %cst_104 [1] : vector<12x32xf32> to vector<12xf32>
    %187 = vector.shape_cast %186 : vector<12xf32> to vector<12x1xf32>
    %cst_105 = arith.constant 3.200000e+01 : f32
    %188 = vector.broadcast %cst_105 : f32 to vector<12x1xf32>
    %189 = arith.divf %187, %188 : vector<12x1xf32>
    %190 = vector.broadcast %189 : vector<12x1xf32> to vector<12x32xf32>
    %191 = arith.subf %169, %190 : vector<12x32xf32>
    %192 = arith.mulf %191, %191 : vector<12x32xf32>
    %cst_106 = arith.constant dense<0.000000e+00> : vector<12xf32>
    %193 = vector.multi_reduction <add>, %192, %cst_106 [1] : vector<12x32xf32> to vector<12xf32>
    %194 = vector.shape_cast %193 : vector<12xf32> to vector<12x1xf32>
    %cst_107 = arith.constant 3.200000e+01 : f32
    %195 = vector.broadcast %cst_107 : f32 to vector<12x1xf32>
    %196 = arith.divf %194, %195 : vector<12x1xf32>
    %197 = vector.broadcast %189 : vector<12x1xf32> to vector<12x32xf32>
    %198 = arith.subf %169, %197 : vector<12x32xf32>
    %cst_108 = arith.constant 9.99999974E-6 : f32
    %199 = vector.broadcast %cst_108 : f32 to vector<12x1xf32>
    %200 = arith.addf %196, %199 : vector<12x1xf32>
    %201 = math.rsqrt %200 : vector<12x1xf32>
    %202 = vector.broadcast %201 : vector<12x1xf32> to vector<12x32xf32>
    %203 = arith.mulf %198, %202 : vector<12x32xf32>
    %204 = vector.broadcast %178 : vector<1x32xf32> to vector<12x32xf32>
    %205 = arith.mulf %203, %204 : vector<12x32xf32>
    %206 = vector.broadcast %179 : vector<1x32xf32> to vector<12x32xf32>
    %207 = arith.addf %205, %206 : vector<12x32xf32>
    %cst_109 = arith.constant dense<0.000000e+00> : vector<12x96xf32>
    %208 = tpu.matmul %207, %171, %cst_109 {dimension_numbers = #tpu.dot_dimension_numbers<[1], [0], [0], [1], [0, 0, 1, 1], [], []>} : vector<12x32xf32>, vector<32x96xf32>, vector<12x96xf32> -> vector<12x96xf32>
    %209 = vector.broadcast %180 : vector<1x96xf32> to vector<12x96xf32>
    %210 = arith.addf %208, %209 : vector<12x96xf32>
    %211 = vector.extract_strided_slice %210 {offsets = [0, 0], sizes = [12, 8], strides = [1, 1]} : vector<12x96xf32> to vector<12x8xf32>
    %212 = vector.extract_strided_slice %210 {offsets = [0, 32], sizes = [12, 8], strides = [1, 1]} : vector<12x96xf32> to vector<12x8xf32>
    %213 = vector.extract_strided_slice %210 {offsets = [0, 64], sizes = [12, 8], strides = [1, 1]} : vector<12x96xf32> to vector<12x8xf32>
    "tpu.trace_start"() <{level = 10 : i32, message = "qd,kd->qk"}> : () -> ()
    %cst_110 = arith.constant dense<0.000000e+00> : vector<12x12xf32>
    %214 = tpu.matmul %211, %212, %cst_110 {dimension_numbers = #tpu.dot_dimension_numbers<[1], [1], [0], [0], [0, 0, 1, 0], [], []>} : vector<12x8xf32>, vector<12x8xf32>, vector<12x12xf32> -> vector<12x12xf32>
    "tpu.trace_stop"() : () -> ()
    %215 = arith.addf %214, %15 : vector<12x12xf32>
    %cst_111 = arith.constant dense<0xFF800000> : vector<12xf32>
    %216 = vector.multi_reduction <maximumf>, %215, %cst_111 [1] : vector<12x12xf32> to vector<12xf32>
    %217 = vector.shape_cast %216 : vector<12xf32> to vector<12x1xf32>
    %218 = vector.broadcast %217 : vector<12x1xf32> to vector<12x12xf32>
    %219 = arith.subf %215, %218 : vector<12x12xf32>
    %220 = math.exp %219 : vector<12x12xf32>
    %cst_112 = arith.constant dense<0.000000e+00> : vector<12xf32>
    %221 = vector.multi_reduction <add>, %220, %cst_112 [1] : vector<12x12xf32> to vector<12xf32>
    %222 = vector.shape_cast %221 : vector<12xf32> to vector<12x1xf32>
    %223 = vector.broadcast %222 : vector<12x1xf32> to vector<12x12xf32>
    %224 = arith.divf %220, %223 : vector<12x12xf32>
    %cst_113 = arith.constant dense<0.000000e+00> : vector<12x8xf32>
    %225 = tpu.matmul %224, %213, %cst_113 {dimension_numbers = #tpu.dot_dimension_numbers<[1], [0], [0], [1], [0, 0, 1, 1], [], []>} : vector<12x12xf32>, vector<12x8xf32>, vector<12x8xf32> -> vector<12x8xf32>
    %c0_114 = arith.constant 0 : index
    %c0_115 = arith.constant 0 : index
    %226 = vector.load %arg9[%c0_114, %c0_115] : memref<12x32xf32, #tpu.memory_space<vmem>>, vector<12x8xf32>
    tpu.vector_store %arg9[%c0_114, %c0_115], %225 {strides = array<i32>} : memref<12x32xf32, #tpu.memory_space<vmem>>, vector<12x8xf32>,
    %227 = vector.extract_strided_slice %210 {offsets = [0, 8], sizes = [12, 8], strides = [1, 1]} : vector<12x96xf32> to vector<12x8xf32>
    %228 = vector.extract_strided_slice %210 {offsets = [0, 40], sizes = [12, 8], strides = [1, 1]} : vector<12x96xf32> to vector<12x8xf32>
    %229 = vector.extract_strided_slice %210 {offsets = [0, 72], sizes = [12, 8], strides = [1, 1]} : vector<12x96xf32> to vector<12x8xf32>
    "tpu.trace_start"() <{level = 10 : i32, message = "qd,kd->qk"}> : () -> ()
    %cst_116 = arith.constant dense<0.000000e+00> : vector<12x12xf32>
    %230 = tpu.matmul %227, %228, %cst_116 {dimension_numbers = #tpu.dot_dimension_numbers<[1], [1], [0], [0], [0, 0, 1, 0], [], []>} : vector<12x8xf32>, vector<12x8xf32>, vector<12x12xf32> -> vector<12x12xf32>
    "tpu.trace_stop"() : () -> ()
    %231 = arith.addf %230, %15 : vector<12x12xf32>
    %cst_117 = arith.constant dense<0xFF800000> : vector<12xf32>
    %232 = vector.multi_reduction <maximumf>, %231, %cst_117 [1] : vector<12x12xf32> to vector<12xf32>
    %233 = vector.shape_cast %232 : vector<12xf32> to vector<12x1xf32>
    %234 = vector.broadcast %233 : vector<12x1xf32> to vector<12x12xf32>
    %235 = arith.subf %231, %234 : vector<12x12xf32>
    %236 = math.exp %235 : vector<12x12xf32>
    %cst_118 = arith.constant dense<0.000000e+00> : vector<12xf32>
    %237 = vector.multi_reduction <add>, %236, %cst_118 [1] : vector<12x12xf32> to vector<12xf32>
    %238 = vector.shape_cast %237 : vector<12xf32> to vector<12x1xf32>
    %239 = vector.broadcast %238 : vector<12x1xf32> to vector<12x12xf32>
    %240 = arith.divf %236, %239 : vector<12x12xf32>
    %cst_119 = arith.constant dense<0.000000e+00> : vector<12x8xf32>
    %241 = tpu.matmul %240, %229, %cst_119 {dimension_numbers = #tpu.dot_dimension_numbers<[1], [0], [0], [1], [0, 0, 1, 1], [], []>} : vector<12x12xf32>, vector<12x8xf32>, vector<12x8xf32> -> vector<12x8xf32>
    %c0_120 = arith.constant 0 : index
    %c8_121 = arith.constant 8 : index
    %242 = vector.load %arg9[%c0_120, %c8_121] : memref<12x32xf32, #tpu.memory_space<vmem>>, vector<12x8xf32>
    tpu.vector_store %arg9[%c0_120, %c8_121], %241 {strides = array<i32>} : memref<12x32xf32, #tpu.memory_space<vmem>>, vector<12x8xf32>,
    %243 = vector.extract_strided_slice %210 {offsets = [0, 16], sizes = [12, 8], strides = [1, 1]} : vector<12x96xf32> to vector<12x8xf32>
    %244 = vector.extract_strided_slice %210 {offsets = [0, 48], sizes = [12, 8], strides = [1, 1]} : vector<12x96xf32> to vector<12x8xf32>
    %245 = vector.extract_strided_slice %210 {offsets = [0, 80], sizes = [12, 8], strides = [1, 1]} : vector<12x96xf32> to vector<12x8xf32>
    "tpu.trace_start"() <{level = 10 : i32, message = "qd,kd->qk"}> : () -> ()
    %cst_122 = arith.constant dense<0.000000e+00> : vector<12x12xf32>
    %246 = tpu.matmul %243, %244, %cst_122 {dimension_numbers = #tpu.dot_dimension_numbers<[1], [1], [0], [0], [0, 0, 1, 0], [], []>} : vector<12x8xf32>, vector<12x8xf32>, vector<12x12xf32> -> vector<12x12xf32>
    "tpu.trace_stop"() : () -> ()
    %247 = arith.addf %246, %15 : vector<12x12xf32>
    %cst_123 = arith.constant dense<0xFF800000> : vector<12xf32>
    %248 = vector.multi_reduction <maximumf>, %247, %cst_123 [1] : vector<12x12xf32> to vector<12xf32>
    %249 = vector.shape_cast %248 : vector<12xf32> to vector<12x1xf32>
    %250 = vector.broadcast %249 : vector<12x1xf32> to vector<12x12xf32>
    %251 = arith.subf %247, %250 : vector<12x12xf32>
    %252 = math.exp %251 : vector<12x12xf32>
    %cst_124 = arith.constant dense<0.000000e+00> : vector<12xf32>
    %253 = vector.multi_reduction <add>, %252, %cst_124 [1] : vector<12x12xf32> to vector<12xf32>
    %254 = vector.shape_cast %253 : vector<12xf32> to vector<12x1xf32>
    %255 = vector.broadcast %254 : vector<12x1xf32> to vector<12x12xf32>
    %256 = arith.divf %252, %255 : vector<12x12xf32>
    %cst_125 = arith.constant dense<0.000000e+00> : vector<12x8xf32>
    %257 = tpu.matmul %256, %245, %cst_125 {dimension_numbers = #tpu.dot_dimension_numbers<[1], [0], [0], [1], [0, 0, 1, 1], [], []>} : vector<12x12xf32>, vector<12x8xf32>, vector<12x8xf32> -> vector<12x8xf32>
    %c0_126 = arith.constant 0 : index
    %c16_127 = arith.constant 16 : index
    %258 = vector.load %arg9[%c0_126, %c16_127] : memref<12x32xf32, #tpu.memory_space<vmem>>, vector<12x8xf32>
    tpu.vector_store %arg9[%c0_126, %c16_127], %257 {strides = array<i32>} : memref<12x32xf32, #tpu.memory_space<vmem>>, vector<12x8xf32>,
    %259 = vector.extract_strided_slice %210 {offsets = [0, 24], sizes = [12, 8], strides = [1, 1]} : vector<12x96xf32> to vector<12x8xf32>
    %260 = vector.extract_strided_slice %210 {offsets = [0, 56], sizes = [12, 8], strides = [1, 1]} : vector<12x96xf32> to vector<12x8xf32>
    %261 = vector.extract_strided_slice %210 {offsets = [0, 88], sizes = [12, 8], strides = [1, 1]} : vector<12x96xf32> to vector<12x8xf32>
    "tpu.trace_start"() <{level = 10 : i32, message = "qd,kd->qk"}> : () -> ()
    %cst_128 = arith.constant dense<0.000000e+00> : vector<12x12xf32>
    %262 = tpu.matmul %259, %260, %cst_128 {dimension_numbers = #tpu.dot_dimension_numbers<[1], [1], [0], [0], [0, 0, 1, 0], [], []>} : vector<12x8xf32>, vector<12x8xf32>, vector<12x12xf32> -> vector<12x12xf32>
    "tpu.trace_stop"() : () -> ()
    %263 = arith.addf %262, %15 : vector<12x12xf32>
    %cst_129 = arith.constant dense<0xFF800000> : vector<12xf32>
    %264 = vector.multi_reduction <maximumf>, %263, %cst_129 [1] : vector<12x12xf32> to vector<12xf32>
    %265 = vector.shape_cast %264 : vector<12xf32> to vector<12x1xf32>
    %266 = vector.broadcast %265 : vector<12x1xf32> to vector<12x12xf32>
    %267 = arith.subf %263, %266 : vector<12x12xf32>
    %268 = math.exp %267 : vector<12x12xf32>
    %cst_130 = arith.constant dense<0.000000e+00> : vector<12xf32>
    %269 = vector.multi_reduction <add>, %268, %cst_130 [1] : vector<12x12xf32> to vector<12xf32>
    %270 = vector.shape_cast %269 : vector<12xf32> to vector<12x1xf32>
    %271 = vector.broadcast %270 : vector<12x1xf32> to vector<12x12xf32>
    %272 = arith.divf %268, %271 : vector<12x12xf32>
    %cst_131 = arith.constant dense<0.000000e+00> : vector<12x8xf32>
    %273 = tpu.matmul %272, %261, %cst_131 {dimension_numbers = #tpu.dot_dimension_numbers<[1], [0], [0], [1], [0, 0, 1, 1], [], []>} : vector<12x12xf32>, vector<12x8xf32>, vector<12x8xf32> -> vector<12x8xf32>
    %c0_132 = arith.constant 0 : index
    %c24_133 = arith.constant 24 : index
    %274 = vector.load %arg9[%c0_132, %c24_133] : memref<12x32xf32, #tpu.memory_space<vmem>>, vector<12x8xf32>
    tpu.vector_store %arg9[%c0_132, %c24_133], %273 {strides = array<i32>} : memref<12x32xf32, #tpu.memory_space<vmem>>, vector<12x8xf32>,
    %c0_134 = arith.constant 0 : index
    %c0_135 = arith.constant 0 : index
    %275 = vector.load %arg9[%c0_134, %c0_135] : memref<12x32xf32, #tpu.memory_space<vmem>>, vector<12x32xf32>
    %cst_136 = arith.constant dense<0.000000e+00> : vector<12x32xf32>
    %276 = tpu.matmul %275, %173, %cst_136 {dimension_numbers = #tpu.dot_dimension_numbers<[1], [0], [0], [1], [0, 0, 1, 1], [], []>} : vector<12x32xf32>, vector<32x32xf32>, vector<12x32xf32> -> vector<12x32xf32>
    %277 = arith.addf %169, %276 : vector<12x32xf32>
    %278 = vector.broadcast %181 : vector<1x32xf32> to vector<12x32xf32>
    %279 = arith.addf %277, %278 : vector<12x32xf32>
    %cst_137 = arith.constant dense<0.000000e+00> : vector<12xf32>
    %280 = vector.multi_reduction <add>, %279, %cst_137 [1] : vector<12x32xf32> to vector<12xf32>
    %281 = vector.shape_cast %280 : vector<12xf32> to vector<12x1xf32>
    %cst_138 = arith.constant 3.200000e+01 : f32
    %282 = vector.broadcast %cst_138 : f32 to vector<12x1xf32>
    %283 = arith.divf %281, %282 : vector<12x1xf32>
    %284 = vector.broadcast %283 : vector<12x1xf32> to vector<12x32xf32>
    %285 = arith.subf %279, %284 : vector<12x32xf32>
    %286 = arith.mulf %285, %285 : vector<12x32xf32>
    %cst_139 = arith.constant dense<0.000000e+00> : vector<12xf32>
    %287 = vector.multi_reduction <add>, %286, %cst_139 [1] : vector<12x32xf32> to vector<12xf32>
    %288 = vector.shape_cast %287 : vector<12xf32> to vector<12x1xf32>
    %cst_140 = arith.constant 3.200000e+01 : f32
    %289 = vector.broadcast %cst_140 : f32 to vector<12x1xf32>
    %290 = arith.divf %288, %289 : vector<12x1xf32>
    %291 = vector.broadcast %283 : vector<12x1xf32> to vector<12x32xf32>
    %292 = arith.subf %279, %291 : vector<12x32xf32>
    %cst_141 = arith.constant 9.99999974E-6 : f32
    %293 = vector.broadcast %cst_141 : f32 to vector<12x1xf32>
    %294 = arith.addf %290, %293 : vector<12x1xf32>
    %295 = math.rsqrt %294 : vector<12x1xf32>
    %296 = vector.broadcast %295 : vector<12x1xf32> to vector<12x32xf32>
    %297 = arith.mulf %292, %296 : vector<12x32xf32>
    %298 = vector.broadcast %182 : vector<1x32xf32> to vector<12x32xf32>
    %299 = arith.mulf %297, %298 : vector<12x32xf32>
    %300 = vector.broadcast %183 : vector<1x32xf32> to vector<12x32xf32>
    %301 = arith.addf %299, %300 : vector<12x32xf32>
    %cst_142 = arith.constant dense<0.000000e+00> : vector<12x128xf32>
    %302 = tpu.matmul %301, %175, %cst_142 {dimension_numbers = #tpu.dot_dimension_numbers<[1], [0], [0], [1], [0, 0, 1, 1], [], []>} : vector<12x32xf32>, vector<32x128xf32>, vector<12x128xf32> -> vector<12x128xf32>
    %303 = vector.broadcast %184 : vector<1x128xf32> to vector<12x128xf32>
    %304 = arith.addf %302, %303 : vector<12x128xf32>
    %cst_143 = arith.constant 5.000000e-01 : f32
    %305 = vector.broadcast %cst_143 : f32 to vector<12x128xf32>
    %306 = arith.mulf %305, %304 : vector<12x128xf32>
    %cst_144 = arith.constant 0.636619746 : f32
    %307 = math.sqrt %cst_144 : f32
    %cst_145 = arith.constant 4.471500e-02 : f32
    %308 = vector.broadcast %cst_145 : f32 to vector<12x128xf32>
    %309 = arith.mulf %308, %304 : vector<12x128xf32>
    %310 = arith.mulf %309, %304 : vector<12x128xf32>
    %311 = arith.mulf %310, %304 : vector<12x128xf32>
    %312 = arith.addf %304, %311 : vector<12x128xf32>
    %313 = vector.broadcast %307 : f32 to vector<12x128xf32>
    %314 = arith.mulf %313, %312 : vector<12x128xf32>
    %315 = math.tanh %314 : vector<12x128xf32>
    %cst_146 = arith.constant 1.000000e+00 : f32
    %316 = vector.broadcast %cst_146 : f32 to vector<12x128xf32>
    %317 = arith.addf %316, %315 : vector<12x128xf32>
    %318 = arith.mulf %306, %317 : vector<12x128xf32>
    %cst_147 = arith.constant dense<0.000000e+00> : vector<12x32xf32>
    %319 = tpu.matmul %318, %177, %cst_147 {dimension_numbers = #tpu.dot_dimension_numbers<[1], [0], [0], [1], [0, 0, 1, 1], [], []>} : vector<12x128xf32>, vector<128x32xf32>, vector<12x32xf32> -> vector<12x32xf32>
    %320 = arith.addf %279, %319 : vector<12x32xf32>
    %321 = vector.broadcast %185 : vector<1x32xf32> to vector<12x32xf32>
    %322 = arith.addf %320, %321 : vector<12x32xf32>
    %c2 = arith.constant 2 : index
    %c0_148 = arith.constant 0 : index
    %323 = vector.load %arg6[%c2, %c0_148] : memref<3x416xf32, #tpu.memory_space<vmem>>, vector<1x32xf32>
    %c2_149 = arith.constant 2 : index
    %c32_150 = arith.constant 32 : index
    %324 = vector.load %arg6[%c2_149, %c32_150] : memref<3x416xf32, #tpu.memory_space<vmem>>, vector<1x32xf32>
    %cst_151 = arith.constant dense<0.000000e+00> : vector<12xf32>
    %325 = vector.multi_reduction <add>, %322, %cst_151 [1] : vector<12x32xf32> to vector<12xf32>
    %326 = vector.shape_cast %325 : vector<12xf32> to vector<12x1xf32>
    %cst_152 = arith.constant 3.200000e+01 : f32
    %327 = vector.broadcast %cst_152 : f32 to vector<12x1xf32>
    %328 = arith.divf %326, %327 : vector<12x1xf32>
    %329 = vector.broadcast %328 : vector<12x1xf32> to vector<12x32xf32>
    %330 = arith.subf %322, %329 : vector<12x32xf32>
    %331 = arith.mulf %330, %330 : vector<12x32xf32>
    %cst_153 = arith.constant dense<0.000000e+00> : vector<12xf32>
    %332 = vector.multi_reduction <add>, %331, %cst_153 [1] : vector<12x32xf32> to vector<12xf32>
    %333 = vector.shape_cast %332 : vector<12xf32> to vector<12x1xf32>
    %cst_154 = arith.constant 3.200000e+01 : f32
    %334 = vector.broadcast %cst_154 : f32 to vector<12x1xf32>
    %335 = arith.divf %333, %334 : vector<12x1xf32>
    %336 = vector.broadcast %328 : vector<12x1xf32> to vector<12x32xf32>
    %337 = arith.subf %322, %336 : vector<12x32xf32>
    %cst_155 = arith.constant 9.99999974E-6 : f32
    %338 = vector.broadcast %cst_155 : f32 to vector<12x1xf32>
    %339 = arith.addf %335, %338 : vector<12x1xf32>
    %340 = math.rsqrt %339 : vector<12x1xf32>
    %341 = vector.broadcast %340 : vector<12x1xf32> to vector<12x32xf32>
    %342 = arith.mulf %337, %341 : vector<12x32xf32>
    %343 = vector.broadcast %323 : vector<1x32xf32> to vector<12x32xf32>
    %344 = arith.mulf %342, %343 : vector<12x32xf32>
    %345 = vector.broadcast %324 : vector<1x32xf32> to vector<12x32xf32>
    %346 = arith.addf %344, %345 : vector<12x32xf32>
    %c0_156 = arith.constant 0 : index
    %c0_157 = arith.constant 0 : index
    %c0_158 = arith.constant 0 : index
    %347 = vector.load %arg7[%c0_156, %c0_157, %c0_158] : memref<1x12x32xf32, #tpu.memory_space<vmem>>, vector<1x12x32xf32>
    %348 = vector.shape_cast %347 : vector<1x12x32xf32> to vector<12x32xf32>
    %349 = vector.shape_cast %346 : vector<12x32xf32> to vector<1x12x32xf32>
    tpu.vector_store %arg7[%c0_156, %c0_157, %c0_158], %349 {strides = array<i32>} : memref<1x12x32xf32, #tpu.memory_space<vmem>>, vector<1x12x32xf32>,
    return
  }
  func.func @transform_0(%arg0: i32) -> (i32, i32, i32) {
    %c0_i32 = arith.constant 0 : i32
    %c0_i32_0 = arith.constant 0 : i32
    %c0_i32_1 = arith.constant 0 : i32
    return %arg0, %c0_i32, %c0_i32_0 : i32, i32, i32
  }
  func.func @transform_1(%arg0: i32) -> (i32, i32, i32) {
    %c0_i32 = arith.constant 0 : i32
    %c0_i32_0 = arith.constant 0 : i32
    %c0_i32_1 = arith.constant 0 : i32
    return %arg0, %c0_i32, %c0_i32_0 : i32, i32, i32
  }
  func.func @transform_2(%arg0: i32) -> (i32, i32) {
    %c0_i32 = arith.constant 0 : i32
    %c0_i32_0 = arith.constant 0 : i32
    %c0_i32_1 = arith.constant 0 : i32
    return %c0_i32, %c0_i32_0 : i32, i32
  }
  func.func @transform_3(%arg0: i32) -> (i32, i32, i32) {
    %c0_i32 = arith.constant 0 : i32
    %c0_i32_0 = arith.constant 0 : i32
    %c0_i32_1 = arith.constant 0 : i32
    %c0_i32_2 = arith.constant 0 : i32
    return %c0_i32, %c0_i32_0, %c0_i32_1 : i32, i32, i32
  }
  func.func @transform_4(%arg0: i32) -> (i32, i32, i32) {
    %c0_i32 = arith.constant 0 : i32
    %c0_i32_0 = arith.constant 0 : i32
    %c0_i32_1 = arith.constant 0 : i32
    %c0_i32_2 = arith.constant 0 : i32
    return %c0_i32, %c0_i32_0, %c0_i32_1 : i32, i32, i32
  }
  func.func @transform_5(%arg0: i32) -> (i32, i32) {
    %c0_i32 = arith.constant 0 : i32
    %c0_i32_0 = arith.constant 0 : i32
    %c0_i32_1 = arith.constant 0 : i32
    return %c0_i32, %c0_i32_0 : i32, i32
  }
  func.func @transform_6(%arg0: i32) -> (i32, i32, i32) {
    %c0_i32 = arith.constant 0 : i32
    %c0_i32_0 = arith.constant 0 : i32
    %c0_i32_1 = arith.constant 0 : i32
    return %arg0, %c0_i32, %c0_i32_0 : i32, i32, i32
  }
}

</mosaic_0001>

<bundles_post_ra>
// kernel: dtrocr_forward.1
= control target key start
LH: loop header
LB: loop body
LE: loop exit
PB: predicated region body
PF: predicated region fallthrough
CT: control target
= control target key end

     0   :  { %s4224_s21 = smov 0   ;;  %s4934_s0 = inlined_call_operand.vmem [shape: f32[2,12,32], index: 0, kind: input, shape index: {}]   ;;  %s4935_s1 = inlined_call_operand.vmem [shape: f32[2,4,192], index: 1, kind: input, shape index: {}]   ;;  %s4936_s2 = inlined_call_operand.vmem [shape: f32[192,32], index: 2, kind: input, shape index: {}]   ;;  %s4937_s3 = inlined_call_operand.vmem [shape: f32[2,32,256], index: 3, kind: input, shape index: {}]   ;;  %s4938_s4 = inlined_call_operand.vmem [shape: f32[2,128,32], index: 4, kind: input, shape index: {}]   ;;  %s4939_s5 = inlined_call_operand.vmem [shape: f32[3,416], index: 5, kind: input, shape index: {}]   ;;  %s4940_s6 = inlined_call_operand.vmem [shape: f32[2,12,32], index: 6, kind: output, shape index: {}]  }
   0x1 LB: > { %s3198_s22 = sadd.s32 4294967295, %s4169_s21   ;;  %p3202_p0 = scmp.ge.s32.totalorder %s4169_s21, 1  ;;  %s4169_s21 = sphi %s4224_s21, %s16_s21  }
   0x2   : > { %p222_p1 = scmp.lt.s32.totalorder %s4169_s21, 3 }
   0x4   : > { %p223_p2 = pnand %p3202_p0, %p222_p1 }
   0x5   : > { %v280_v0 = vld [vmem:[%s4936_s2] sm:$0xff] (!%p223_p2)  ;;  %v281_v1 = vld [vmem:[%s4936_s2 + $0x8] sm:$0xff] (!%p223_p2)  ;;  %v282_v2 = vld [vmem:[%s4936_s2 + $0x10] sm:$0xff] (!%p223_p2)  ;;  %p257_p3 = scmp.lt.s32.totalorder (!%p223_p2), %s3198_s22, 1  ;;  %v4171_v3 = vmov (!%p223_p2), 0.0|0.0   ;;  %vm274_vm0 = vcmask (!%p223_p2), 261120  }
   0x6   : > { %226 = sbr.rel (%p223_p2) target bundleno = 8904 (0x22c8), region = 44  ;;  %3700 = vmatprep.subr.bf16.mxu0 (!%p223_p2), %v4171_v3  ;;  %v3701_v4 = vpack.c.bf16 (!%p223_p2), %v281_v1, %v280_v0  ;;  %v283_v5 = vld [vmem:[%s4936_s2 + $0x18] sm:$0xff] (!%p223_p2)  ;;  %v284_v7 = vld [vmem:[%s4936_s2 + $0x20] sm:$0xff] (!%p223_p2)  ;;  %v285_v8 = vld [vmem:[%s4936_s2 + $0x28] sm:$0xff] (!%p223_p2)  ;;  %vm276_vm1 = vcmask (!%p223_p2), 257024   ;;  %vm306_vm2 = vcmask (!%p223_p2), 523264  }
   0x7   : > { %v3704_v6 = vpack.c.bf16 (!%p223_p2), %v283_v5, %v282_v2  ;;  %v3707_v9 = vpack.c.bf16 (!%p223_p2), %v285_v8, %v284_v7  ;;  %v286_v10 = vld [vmem:[%s4936_s2 + $0x30] sm:$0xff] (!%p223_p2)  ;;  %v287_v11 = vld [vmem:[%s4936_s2 + $0x38] sm:$0xff] (!%p223_p2)  ;;  %v288_v17 = vld [vmem:[%s4936_s2 + $0x40] sm:$0xff] (!%p223_p2)  ;;  %s4173_s28 = smov (!%p223_p2), 64   ;;  %vm574_vm3 = vcmask (!%p223_p2), 64512   ;;  %vm662_vm7 = vcmask (!%p223_p2), 93184  }
   0x8   : > { %3702 = vmatpush1.bf16.msra.mxu0 (!%p223_p2), %v3701_v4  ;;  %v3710_v16 = vpack.c.bf16 (!%p223_p2), %v287_v11, %v286_v10  ;;  %v289_v18 = vld [vmem:[%s4936_s2 + $0x48] sm:$0xff] (!%p223_p2)  ;;  %v290_v20 = vld [vmem:[%s4936_s2 + $0x50] sm:$0xff] (!%p223_p2)  ;;  %v291_v21 = vld [vmem:[%s4936_s2 + $0x58] sm:$0xff] (!%p223_p2)  ;;  %vm658_vm8 = vcmask (!%p223_p2), 97280   ;;  %s4175_s29 = smov (!%p223_p2), 88   ;;  %s4176_s30 = smov (!%p223_p2), 120  }
   0x9   : > { %3703 = vmatprep.subr.bf16.mxu0 (!%p223_p2), %v4171_v3  ;;  %v3713_v19 = vpack.c.bf16 (!%p223_p2), %v289_v18, %v288_v17  ;;  %v3716_v22 = vpack.c.bf16 (!%p223_p2), %v291_v21, %v290_v20  ;;  %v292_v23 = vld [vmem:[%s4936_s2 + $0x60] sm:$0xff] (!%p223_p2)  ;;  %v293_v24 = vld [vmem:[%s4936_s2 + $0x68] sm:$0xff] (!%p223_p2)  ;;  %v294_v26 = vld [vmem:[%s4936_s2 + $0x70] sm:$0xff] (!%p223_p2)  ;;  %vm693_vm9 = vcmask (!%p223_p2), 1043456   ;;  %vm4177_vm10 = vmmov (!%p223_p2), 1   ;;  %s4178_s7 = smov (!%p223_p2), 80  }
   0xa   : > { %v3719_v25 = vpack.c.bf16 (!%p223_p2), %v293_v24, %v292_v23  ;;  %v295_v27 = vld [vmem:[%s4936_s2 + $0x78] sm:$0xff] (!%p223_p2)  ;;  %v296_v29 = vld [vmem:[%s4936_s2 + $0x80] sm:$0xff] (!%p223_p2)  ;;  %v297_v30 = vld [vmem:[%s4936_s2 + $0x88] sm:$0xff] (!%p223_p2)  ;;  %vm772_vm12 = vcmask (!%p223_p2), 60416   ;;  %s4179_s8 = smov (!%p223_p2), 112   ;;  %s4180_s9 = smov (!%p223_p2), 56  }
   0xb   : > { %v3722_v28 = vpack.c.bf16 (!%p223_p2), %v295_v27, %v294_v26  ;;  %v3725_v31 = vpack.c.bf16 (!%p223_p2), %v297_v30, %v296_v29  ;;  %v298_v32 = vld [vmem:[%s4936_s2 + $0x90] sm:$0xff] (!%p223_p2)  ;;  %v299_v33 = vld [vmem:[%s4936_s2 + $0x98] sm:$0xff] (!%p223_p2)  ;;  %v300_v35 = vld [vmem:[%s4936_s2 + $0xa0] sm:$0xff] (!%p223_p2)  ;;  %s4181_s10 = smov (!%p223_p2), 72   ;;  %s4183_s13 = smov (!%p223_p2), 48   ;;  %vm983_vm13 = vcmask (!%p223_p2), 130112  }
   0xc   : > { %3705 = vmatpush1.bf16.msra.mxu0 (!%p223_p2), %v3704_v6  ;;  %v3728_v34 = vpack.c.bf16 (!%p223_p2), %v299_v33, %v298_v32  ;;  %v301_v36 = vld [vmem:[%s4936_s2 + $0xa8] sm:$0xff] (!%p223_p2)  ;;  %v302_v38 = vld [vmem:[%s4936_s2 + $0xb0] sm:$0xff] (!%p223_p2)  ;;  %v303_v39 = vld [vmem:[%s4936_s2 + $0xb8] sm:$0xff] (!%p223_p2)  ;;  %s4184_s14 = smov (!%p223_p2), 8   ;;  %s4185_s16 = smov (!%p223_p2), 16   ;;  %vm985_vm14 = vcmask (!%p223_p2), 126016  }
   0xd   : > { %s4956_s22 = smov (!%p257_p3, %s3198_s22), 1  ;;  %3706 = vmatprep.subr.bf16.mxu0 %v4171_v3  ;;  %v3731_v37 = vpack.c.bf16 %v301_v36, %v300_v35  ;;  %v3734_v40 = vpack.c.bf16 %v303_v39, %v302_v38  ;;  %v3210_v49 = vld [vmem:[%s4939_s5] ss:$0 sm:$0xff]  ;;  %v4356_v61 = vld [vmem:[%s4937_s3 + $0x10] sm:$0xff]  ;;  %vm4407_vm4 = vmpackc.low %vm574_vm3, %vm574_vm3  ;;  %vm1196_vm15 = vcmask 195712   ;;  %s4946_s17 = smov 40  }
   0xe   : > { %s4941_s11 = sshll.u32 %s4956_s22, 4  ;;  %s3314_s12 = sshll.u32 %s4956_s22, 3  ;;  %v4351_v60 = vld [vmem:[%s4937_s3] sm:$0xff]  ;;  %v4370_v1 = vld [vmem:[%s4937_s3 + $0x30] sm:$0xff]  ;;  %vm4437_vm11 = vmpackc.low %vm693_vm9, %vm4177_vm10  ;;  %vm1409_vm9 = vcmask 261312  }
   0xf   : > { %s261_s15 = scalar_lea.vmem %s4934_s0, %s4941_s11  ;;  %s266_s18 = scalar_lea.vmem %s4935_s1, %s3314_s12  ;;  %v4010_v62 = vpack.i.bf16 %v4356_v61, %v4351_v60  ;;  %v3736_v63 = vpack.c.bf16 %v4356_v61, %v4351_v60  ;;  %v4365_v0 = vld [vmem:[%s4937_s3 + $0x20] sm:$0xff] }
  0x10   : > { %v272_v12 = vld [vmem:[%s261_s15] sm:$0xff]  ;;  %v273_v13 = vld [vmem:[%s261_s15 + $0x8] sm:$0xf]  ;;  %3708 = vmatpush1.bf16.msra.mxu0 %v3707_v9  ;;  %s4172_s15 = smov 96   ;;  %v3740_v2 = vpack.c.bf16 %v4370_v1, %v4365_v0  ;;  %s4182_s12 = smov 104  }
  0x11   : > { %v279_v14 = vld [vmem:[%s266_s18] sm:$0xff]  ;;  %277 = vst.msk [vmem:[#allocation2 + $0x8] sm:$0xf] %vm276_vm1, %v273_v13  ;;  %3709 = vmatprep.subr.bf16.mxu0 %v4171_v3  ;;  %3737 = vmatprep.subr.bf16.mxu1 %v3736_v63  ;;  %s4944_s18 = smov 32   ;;  %s4942_s19 = smov 24  }
  0x12   : > { %v305_v15 = vcombine.high %v279_v14, %v279_v14  ;;  %275 = vst.msk [vmem:[#allocation2] sm:$0xff] %vm274_vm0, %v272_v12  ;;  %3739 = vmatpush3.bf16.msra.mxu1 %v3736_v63  ;;  %v417_v5 = vld [vmem:[%s4939_s5] sm:$0x11] }
  0x13   : > { %3741 = vmatprep.subr.bf16.mxu1 %v3740_v2 }
  0x14   : > { %3209 = vmatprep.mubr.msk.f32.mxu0 %vm306_vm2, %v305_v15  ;;  %3711 = vmatpush1.bf16.msra.mxu0 %v3710_v16 }
  0x15   : > { %3712 = vmatprep.subr.bf16.mxu0 %v4171_v3 }
  0x16   : > { %3743 = vmatpush3.bf16.msra.mxu1 %v3740_v2 }
  0x18   : > { %3714 = vmatpush1.bf16.msra.mxu0 %v3713_v19  ;;  %v4334_v46 = vld [vmem:[#allocation2 + $0x8] sm:$0xf] }
  0x19   : > { %3715 = vmatprep.subr.bf16.mxu0 %v4171_v3  ;;  %v278_v41 = vld [vmem:[#allocation2] sm:$0xf]  ;;  %v424_v48 = vsel %vm276_vm1, %v4334_v46, 0.0 }
  0x1c   : > { %3717 = vmatpush1.bf16.msra.mxu0 %v3716_v22 }
  0x1d   : > { %3718 = vmatprep.subr.bf16.mxu0 %v4171_v3 }
  0x20   : > { %3720 = vmatpush1.bf16.msra.mxu0 %v3719_v25 }
  0x21   : > { %3721 = vmatprep.subr.bf16.mxu0 %v4171_v3 }
  0x24   : > { %3723 = vmatpush1.bf16.msra.mxu0 %v3722_v28 }
  0x25   : > { %3724 = vmatprep.subr.bf16.mxu0 %v4171_v3 }
  0x28   : > { %3726 = vmatpush1.bf16.msra.mxu0 %v3725_v31 }
  0x29   : > { %3727 = vmatprep.subr.bf16.mxu0 %v4171_v3 }
  0x2c   : > { %3729 = vmatpush1.bf16.msra.mxu0 %v3728_v34 }
  0x2d   : > { %3730 = vmatprep.subr.bf16.mxu0 %v4171_v3 }
  0x30   : > { %3732 = vmatpush1.bf16.msra.mxu0 %v3731_v37 }
  0x31   : > { %3733 = vmatprep.subr.bf16.mxu0 %v4171_v3  ;;  %v381_v3 = vlaneseq }
  0x33   : > { %v4374_v4 = vshrl.u32 %v381_v3, 7 }
  0x34   : > { %3735 = vmatpush1.bf16.msra.mxu0 %v3734_v40 }
  0x35   : > { %v4380_v6 = vsub.s32 0, %v4374_v4  ;;  %v467_v7 = vsub.s32 4, %v4374_v4  ;;  %v383_v40 = vadd.s32 8, %v4374_v4 }
  0x37   : > { %374 = vmatmul.mubr.f32.vlgmr.msra.gmra.mrb[0].mxu0 %v279_v14  ;;  %v464_v8 = vrot.slane %v417_v5, %v4380_v6  ;;  %v468_v9 = vrot.slane %v417_v5, %v467_v7 }
  0x39   : > { %v474_v10 = vrot.slane %v464_v8, %v4380_v6  ;;  %v478_v11 = vrot.slane %v468_v9, %v4380_v6 }
 0x10a   : > { %v375_v42 = vpop.f32.mrb[0].mxu0 }
 0x10b   : > { %v379_v43 = vadd.f32 %v375_v42, %v278_v41  ;;  %v377_v44 = vpop.f32.mrb[1].mxu0  ;;  %v385_v41 = vand.u32 127, %v381_v3  ;;  %v4174_v42 = vmov -1e+30  }
 0x10d   : > { %380 = vst.msk [vmem:[#allocation2] sm:$0xf] %vm276_vm1, %v379_v43  ;;  %vm387_vm5 = vcmp.le.s32.totalorder %v385_v41, %v383_v40  ;;  %vm386_vm6 = vcmp.le.s32.totalorder %v385_v41, %v4374_v4 }
 0x10e   : > { %v4419_v43 = vsel %vm387_vm5, 0.0, %v4174_v42  ;;  %v4421_v44 = vsel %vm386_vm6, 0.0, %v4174_v42  ;;  %vm1198_vm5 = vcmask 191616   ;;  %vm1411_vm6 = vcmask 257216  }
 0x114   : > { %v4332_v45 = vld [vmem:[#allocation2] sm:$0xff] }
 0x115   : > { %v421_v47 = vsel %vm274_vm0, %v4332_v45, 0.0 }
 0x116   : > { %422 = vadd.xlane.f32.xlu0 %v421_v47 }
 0x11a   : > { %425 = vadd.xlane.f32.xlu0 %v424_v48 }
 0x130   : > { %455 = vrot.lane.b32.xlu0 %v3210_v49, %s4172_s15 }
 0x1a3   : > { %v423_v50 = vpop.xlane.xlu0 %422 }
 0x1a4   : > { %v428_v51 = vmul.f32 0.03125, %v423_v50 }
 0x1a6   : > { %v430_v52 = vsub.f32 %v4332_v45, %v428_v51 }
 0x1a7   : > { %v426_v53 = vpop.xlane.xlu0 %425 }
 0x1a8   : > { %v429_v54 = vmul.f32 0.03125, %v426_v53  ;;  %v432_v55 = vmul.f32 %v430_v52, %v430_v52 }
 0x1aa   : > { %v431_v56 = vsub.f32 %v4334_v46, %v429_v54  ;;  %v434_v57 = vsel %vm274_vm0, %v432_v55, 0.0 }
 0x1ab   : > { %435 = vadd.xlane.f32.xlu1 %v434_v57  ;;  %v456_v20 = vpop.permute.xlu0 %455 }
 0x1ac   : > { %v433_v58 = vmul.f32 %v431_v56, %v431_v56 }
 0x1ae   : > { %v437_v59 = vsel %vm276_vm1, %v433_v58, 0.0 }
 0x1af   : > { %438 = vadd.xlane.f32.xlu1 %v437_v59 }
 0x1c0   : > { %481 = vrot.lane.b32.xlu1 %v474_v10, %s4173_s28 }
 0x1c4   : > { %483 = vrot.lane.b32.xlu1 %v478_v11, %s4173_s28 }
 0x238   : > { %v436_v12 = vpop.xlane.xlu1 %435 }
 0x239   : > { %v440_v13 = vmul.f32 0.03125, %v436_v12 }
 0x23b   : > { %v442_v14 = vadd.f32 1e-05, %v440_v13 }
 0x23c   : > { %v439_v15 = vpop.xlane.xlu1 %438 }
 0x23d   : > { %4071 = vrsqrt.f32 %v442_v14  ;;  %v441_v16 = vmul.f32 0.03125, %v439_v15 }
 0x23f   : > { %v443_v17 = vadd.f32 1e-05, %v441_v16 }
 0x240   : > { %v482_v27 = vpop.permute.xlu1 %481 }
 0x241   : > { %4073 = vrsqrt.f32 %v443_v17 }
 0x244   : > { %v484_v28 = vpop.permute.xlu1 %483 }
 0x245   : > { %v485_v29 = vsel %vm306_vm2, %v482_v27, %v484_v28 }
 0x247   : > { %v4072_v18 = vpop.eup %4071 }
 0x248   : > { %v446_v19 = vmul.f32 %v4072_v18, %v430_v52 }
 0x24a   : > { %v452_v21 = vmul.f32 %v3210_v49, %v446_v19 }
 0x24b   : > { %v4074_v22 = vpop.eup %4073 }
 0x24c   : > { %v447_v23 = vmul.f32 %v4074_v22, %v431_v56  ;;  %v458_v24 = vadd.f32 %v456_v20, %v452_v21 }
 0x24e   : > { %v453_v25 = vmul.f32 %v3210_v49, %v447_v23  ;;  %3460 = vmatprep.mubr.msk.f32.mxu1 %vm274_vm0, %v458_v24 }
 0x250   : > { %v459_v26 = vadd.f32 %v456_v20, %v453_v25 }
 0x252   : > { %3461 = vmatmul.mubr.msk.f32.vlgmr.msra.gmra.mrb[0].mxu1 %vm274_vm0, %v459_v26 }
 0x325   : > { %v3462_v30 = vpop.f32.mrb[0].mxu1 }
 0x326   : > { %v4393_v31 = vadd.f32 %v3462_v30, %v485_v29  ;;  %v559_v32 = vpop.f32.mrb[1].mxu1 }
 0x327   : > { %v4395_v33 = vadd.f32 %v559_v32, %v485_v29 }
 0x329   : > { %3467 = vmatprep.mubr.msk.f32.mxu1 %vm574_vm3, %v4395_v33  ;;  %v4401_v34 = vpack.i.bf16 %v4393_v31, %v4395_v33 }
 0x32b   : > { %3971 = vrot.lane.b32.xlu1 %v4401_v34, %s4172_s15 }
 0x39d   : > { %v3972_v35 = vpop.permute.xlu1 %3971 }
 0x39e   : > { %v3974_v36 = vunpack.i.h.bf16 %v3972_v35  ;;  %v3973_v37 = vunpack.i.l.bf16 %v3972_v35 }
 0x3a0   : > { %v3744_v39 = vpack.c.bf16 %v3974_v36, %v3973_v37 }
 0x3a2   : > { %3746 = vmatprep.subr.msk.bf16.mxu1 %vm4407_vm4, %v3744_v39 }
 0x3a3   : > { %3749 = vmatpush3.bf16.xpose.msk.msra.mxu1 %vm4407_vm4, %v3744_v39 }
 0x3aa   : > { %3468 = vmatmul.mubr.msk.f32.vlgmr.msra.gmra.mrb[2].mxu1 %vm574_vm3, %v4393_v31 }
 0x47d   : > { %v3469_v47 = vpop.f32.mrb[2].mxu1 }
 0x47e   : > { %v655_v48 = vadd.f32 %v3469_v47, %v4419_v43  ;;  %v649_v49 = vpop.f32.mrb[3].mxu1 }
 0x47f   : > { %v650_v50 = vadd.f32 %v649_v49, %v4421_v44 }
 0x480   : > { %v663_v51 = vsel %vm662_vm7, %v655_v48, -inf }
 0x481   : > { %664 = vmax.xlane.f32.xlu1 %v663_v51  ;;  %v659_v52 = vsel %vm658_vm8, %v650_v50, -inf }
 0x482   : > { %660 = vmax.xlane.f32.xlu0 %v659_v52 }
 0x492   : > { %3981 = vrot.lane.b32.xlu1 %v4401_v34, %s4175_s29 }
 0x496   : > { %774 = vrot.lane.b32.xlu1 %v4395_v33, %s4176_s30 }
 0x49a   : > { %776 = vrot.lane.b32.xlu1 %v4393_v31, %s4176_s30 }
 0x50e   : > { %v665_v53 = vpop.xlane.xlu1 %664 }
 0x50f   : > { %v667_v54 = vsub.f32 %v655_v48, %v665_v53  ;;  %v661_v55 = vpop.xlane.xlu0 %660 }
 0x510   : > { %v666_v56 = vsub.f32 %v650_v50, %v661_v55 }
 0x511   : > { %v670_v57 = vmul.f32 1.442695, %v667_v54 }
 0x512   : > { %v668_v58 = vmul.f32 1.442695, %v666_v56  ;;  %v3982_v9 = vpop.permute.xlu1 %3981 }
 0x513   : > { %4075 = vpow2.f32 %v670_v57  ;;  %v3984_v11 = vunpack.i.h.bf16 %v3982_v9  ;;  %v3983_v12 = vunpack.i.l.bf16 %v3982_v9 }
 0x514   : > { %4077 = vpow2.f32 %v668_v58 }
 0x515   : > { %v3756_v17 = vpack.c.bf16 %v3984_v11, %v3983_v12 }
 0x516   : > { %v775_v22 = vpop.permute.xlu1 %774 }
 0x51a   : > { %v777_v23 = vpop.permute.xlu1 %776 }
 0x51d   : > { %v4076_v59 = vpop.eup %4075 }
 0x51e   : > { %v675_v63 = vsel %vm662_vm7, %v4076_v59, 0.0  ;;  %v4078_v2 = vpop.eup %4077 }
 0x51f   : > { %676 = vadd.xlane.f32.xlu0 %v675_v63  ;;  %v672_v3 = vsel %vm658_vm8, %v4078_v2, 0.0 }
 0x523   : > { %673 = vadd.xlane.f32.xlu0 %v672_v3 }
 0x539   : > { %3976 = vrot.lane.b32.xlu0 %v4401_v34, %s4173_s28 }
 0x5ac   : > { %v677_v5 = vpop.xlane.xlu0 %676 }
 0x5ad   : > { %4079 = vrcp.f32 %v677_v5 }
 0x5b0   : > { %v674_v8 = vpop.xlane.xlu0 %673 }
 0x5b1   : > { %4081 = vrcp.f32 %v674_v8 }
 0x5b4   : > { %v3977_v10 = vpop.permute.xlu0 %3976 }
 0x5b5   : > { %v3979_v13 = vunpack.i.h.bf16 %v3977_v10  ;;  %v3978_v14 = vunpack.i.l.bf16 %v3977_v10 }
 0x5b7   : > { %v3750_v16 = vpack.c.bf16 %v3979_v13, %v3978_v14  ;;  %v4080_v18 = vpop.eup %4079 }
 0x5b8   : > { %v681_v21 = vmul.f32 %v4080_v18, %v4076_v59 }
 0x5b9   : > { %3752 = vmatprep.subr.msk.bf16.mxu1 %vm4437_vm11, %v3750_v16 }
 0x5ba   : > { %3755 = vmatpush3.bf16.msk.msra.mxu1 %vm4437_vm11, %v3750_v16 }
 0x5bb   : > { %v4082_v19 = vpop.eup %4081  ;;  %3758 = vmatprep.subr.msk.bf16.mxu1 %vm4407_vm4, %v3756_v17 }
 0x5bc   : > { %v679_v20 = vmul.f32 %v4082_v19, %v4078_v2 }
 0x5be   : > { %3474 = vmatprep.mubr.msk.f32.mxu1 %vm658_vm8, %v679_v20 }
 0x5bf   : > { %3475 = vmatmul.mubr.msk.f32.vlgmr.msra.gmra.mrb[4].mxu1 %vm658_vm8, %v681_v21 }
 0x5c0   : > { %3481 = vmatprep.mubr.msk.f32.mxu1 %vm574_vm3, %v775_v22 }
 0x5c3   : > { %3761 = vmatpush3.bf16.xpose.msk.msra.mxu1 %vm4407_vm4, %v3756_v17 }
 0x5ca   : > { %3482 = vmatmul.mubr.msk.f32.vlgmr.msra.gmra.mrb[6].mxu1 %vm574_vm3, %v777_v23 }
 0x692   : > { %v3476_v24 = vpop.f32.mrb[4].mxu1 }
 0x693   : > { %773 = vst.msk [vmem:[#allocation3 + $0x8] sm:$0xf] %vm772_vm12, %v3476_v24  ;;  %v762_v25 = vpop.f32.mrb[5].mxu1 }
 0x694   : > { %771 = vst.msk [vmem:[#allocation3] sm:$0xff] %vm574_vm3, %v762_v25 }
 0x69d   : > { %v3483_v26 = vpop.f32.mrb[6].mxu1 }
 0x69e   : > { %v862_v27 = vadd.f32 %v3483_v26, %v4419_v43  ;;  %v856_v28 = vpop.f32.mrb[7].mxu1 }
 0x69f   : > { %v857_v29 = vadd.f32 %v856_v28, %v4421_v44 }
 0x6a0   : > { %v868_v30 = vsel %vm662_vm7, %v862_v27, -inf }
 0x6a1   : > { %869 = vmax.xlane.f32.xlu1 %v868_v30  ;;  %v865_v32 = vsel %vm658_vm8, %v857_v29, -inf }
 0x6a2   : > { %866 = vmax.xlane.f32.xlu0 %v865_v32 }
 0x6b2   : > { %3991 = vrot.lane.b32.xlu1 %v4401_v34, %s4178_s7 }
 0x6b6   : > { %987 = vrot.lane.b32.xlu1 %v4395_v33, %s4179_s8 }
 0x6ba   : > { %989 = vrot.lane.b32.xlu1 %v4393_v31, %s4179_s8 }
 0x72e   : > { %v870_v35 = vpop.xlane.xlu1 %869 }
 0x72f   : > { %v872_v36 = vsub.f32 %v862_v27, %v870_v35  ;;  %v867_v37 = vpop.xlane.xlu0 %866 }
 0x730   : > { %v871_v39 = vsub.f32 %v857_v29, %v867_v37 }
 0x731   : > { %v875_v40 = vmul.f32 1.442695, %v872_v36 }
 0x732   : > { %v873_v41 = vmul.f32 1.442695, %v871_v39  ;;  %v3992_v52 = vpop.permute.xlu1 %3991 }
 0x733   : > { %4083 = vpow2.f32 %v875_v40  ;;  %v3994_v54 = vunpack.i.h.bf16 %v3992_v52  ;;  %v3993_v55 = vunpack.i.l.bf16 %v3992_v52 }
 0x734   : > { %4085 = vpow2.f32 %v873_v41 }
 0x735   : > { %v3768_v59 = vpack.c.bf16 %v3994_v54, %v3993_v55 }
 0x736   : > { %v988_v8 = vpop.permute.xlu1 %987 }
 0x73a   : > { %v990_v9 = vpop.permute.xlu1 %989 }
 0x73d   : > { %v4084_v42 = vpop.eup %4083 }
 0x73e   : > { %v880_v47 = vsel %vm662_vm7, %v4084_v42, 0.0  ;;  %v4086_v48 = vpop.eup %4085 }
 0x73f   : > { %881 = vadd.xlane.f32.xlu0 %v880_v47  ;;  %v877_v49 = vsel %vm658_vm8, %v4086_v48, 0.0 }
 0x743   : > { %878 = vadd.xlane.f32.xlu0 %v877_v49 }
 0x759   : > { %3986 = vrot.lane.b32.xlu0 %v4401_v34, %s4180_s9 }
 0x7cc   : > { %v882_v50 = vpop.xlane.xlu0 %881 }
 0x7cd   : > { %4087 = vrcp.f32 %v882_v50 }
 0x7d0   : > { %v879_v51 = vpop.xlane.xlu0 %878 }
 0x7d1   : > { %4089 = vrcp.f32 %v879_v51 }
 0x7d4   : > { %v3987_v53 = vpop.permute.xlu0 %3986 }
 0x7d5   : > { %v3989_v56 = vunpack.i.h.bf16 %v3987_v53  ;;  %v3988_v57 = vunpack.i.l.bf16 %v3987_v53 }
 0x7d7   : > { %v3762_v58 = vpack.c.bf16 %v3989_v56, %v3988_v57  ;;  %v4088_v63 = vpop.eup %4087 }
 0x7d8   : > { %v886_v5 = vmul.f32 %v4088_v63, %v4084_v42 }
 0x7d9   : > { %3764 = vmatprep.subr.msk.bf16.mxu1 %vm4437_vm11, %v3762_v58 }
 0x7da   : > { %3767 = vmatpush3.bf16.msk.msra.mxu1 %vm4437_vm11, %v3762_v58 }
 0x7db   : > { %v4090_v2 = vpop.eup %4089  ;;  %3770 = vmatprep.subr.msk.bf16.mxu1 %vm4407_vm4, %v3768_v59 }
 0x7dc   : > { %v884_v3 = vmul.f32 %v4090_v2, %v4086_v48 }
 0x7de   : > { %3488 = vmatprep.mubr.msk.f32.mxu1 %vm658_vm8, %v884_v3 }
 0x7df   : > { %3489 = vmatmul.mubr.msk.f32.vlgmr.msra.gmra.mrb[8].mxu1 %vm658_vm8, %v886_v5 }
 0x7e0   : > { %3495 = vmatprep.mubr.msk.f32.mxu1 %vm574_vm3, %v988_v8 }
 0x7e3   : > { %3773 = vmatpush3.bf16.xpose.msk.msra.mxu1 %vm4407_vm4, %v3768_v59 }
 0x7ea   : > { %3496 = vmatmul.mubr.msk.f32.vlgmr.msra.gmra.mrb[10].mxu1 %vm574_vm3, %v990_v9 }
 0x8b2   : > { %v4481_v10 = vpop.f32.mrb[8].mxu1 }
 0x8b3   : > { %v4483_v11 = vpop.f32.mrb[9].mxu1 }
 0x8bd   : > { %v3497_v12 = vpop.f32.mrb[10].mxu1 }
 0x8be   : > { %v1075_v13 = vadd.f32 %v3497_v12, %v4419_v43  ;;  %v1069_v14 = vpop.f32.mrb[11].mxu1 }
 0x8bf   : > { %v1070_v16 = vadd.f32 %v1069_v14, %v4421_v44 }
 0x8c0   : > { %v1081_v17 = vsel %vm662_vm7, %v1075_v13, -inf }
 0x8c1   : > { %1082 = vmax.xlane.f32.xlu1 %v1081_v17  ;;  %v1078_v18 = vsel %vm658_vm8, %v1070_v16, -inf }
 0x8c2   : > { %1079 = vmax.xlane.f32.xlu0 %v1078_v18 }
 0x8d2   : > { %4001 = vrot.lane.b32.xlu1 %v4401_v34, %s4181_s10 }
 0x8d6   : > { %1200 = vrot.lane.b32.xlu1 %v4395_v33, %s4182_s12 }
 0x8da   : > { %1202 = vrot.lane.b32.xlu1 %v4393_v31, %s4182_s12 }
 0x94e   : > { %v1083_v19 = vpop.xlane.xlu1 %1082 }
 0x94f   : > { %v1085_v20 = vsub.f32 %v1075_v13, %v1083_v19  ;;  %v1080_v21 = vpop.xlane.xlu0 %1079 }
 0x950   : > { %v1084_v22 = vsub.f32 %v1070_v16, %v1080_v21 }
 0x951   : > { %v1088_v23 = vmul.f32 1.442695, %v1085_v20 }
 0x952   : > { %v1086_v24 = vmul.f32 1.442695, %v1084_v22  ;;  %v4002_v29 = vpop.permute.xlu1 %4001 }
 0x953   : > { %4091 = vpow2.f32 %v1088_v23  ;;  %v4004_v32 = vunpack.i.h.bf16 %v4002_v29  ;;  %v4003_v35 = vunpack.i.l.bf16 %v4002_v29  ;;  %v3243_v29 = vld [vmem:[%s4939_s5 + $0x4] ss:$0 sm:$0xff] }
 0x954   : > { %4093 = vpow2.f32 %v1086_v24 }
 0x955   : > { %v3780_v40 = vpack.c.bf16 %v4004_v32, %v4003_v35 }
 0x956   : > { %v1201_v49 = vpop.permute.xlu1 %1200 }
 0x95a   : > { %v1203_v50 = vpop.permute.xlu1 %1202 }
 0x95d   : > { %v4092_v25 = vpop.eup %4091 }
 0x95e   : > { %v1093_v26 = vsel %vm662_vm7, %v4092_v25, 0.0  ;;  %v4094_v27 = vpop.eup %4093 }
 0x95f   : > { %1094 = vadd.xlane.f32.xlu0 %v1093_v26  ;;  %v1090_v28 = vsel %vm658_vm8, %v4094_v27, 0.0 }
 0x963   : > { %1091 = vadd.xlane.f32.xlu0 %v1090_v28 }
 0x979   : > { %3996 = vrot.lane.b32.xlu0 %v4401_v34, %s4183_s13 }
 0x9ec   : > { %v1095_v31 = vpop.xlane.xlu0 %1094 }
 0x9ed   : > { %4095 = vrcp.f32 %v1095_v31 }
 0x9f0   : > { %v1092_v33 = vpop.xlane.xlu0 %1091 }
 0x9f1   : > { %4097 = vrcp.f32 %v1092_v33  ;;  %v4015_v33 = vpack.i.bf16 %v4370_v1, %v4365_v0 }
 0x9f4   : > { %v3997_v30 = vpop.permute.xlu0 %3996 }
 0x9f5   : > { %v3999_v36 = vunpack.i.h.bf16 %v3997_v30  ;;  %v3998_v37 = vunpack.i.l.bf16 %v3997_v30 }
 0x9f7   : > { %v3774_v39 = vpack.c.bf16 %v3999_v36, %v3998_v37  ;;  %v4096_v41 = vpop.eup %4095 }
 0x9f8   : > { %v1099_v48 = vmul.f32 %v4096_v41, %v4092_v25 }
 0x9f9   : > { %3776 = vmatprep.subr.msk.bf16.mxu1 %vm4437_vm11, %v3774_v39 }
 0x9fa   : > { %3779 = vmatpush3.bf16.msk.msra.mxu1 %vm4437_vm11, %v3774_v39 }
 0x9fb   : > { %v4098_v42 = vpop.eup %4097  ;;  %3782 = vmatprep.subr.msk.bf16.mxu1 %vm4407_vm4, %v3780_v40 }
 0x9fc   : > { %v1097_v47 = vmul.f32 %v4098_v42, %v4094_v27 }
 0x9fe   : > { %3502 = vmatprep.mubr.msk.f32.mxu1 %vm658_vm8, %v1097_v47 }
 0x9ff   : > { %3503 = vmatmul.mubr.msk.f32.vlgmr.msra.gmra.mrb[12].mxu1 %vm658_vm8, %v1099_v48 }
 0xa00   : > { %3509 = vmatprep.mubr.msk.f32.mxu1 %vm574_vm3, %v1201_v49 }
 0xa03   : > { %3785 = vmatpush3.bf16.xpose.msk.msra.mxu1 %vm4407_vm4, %v3780_v40 }
 0xa0a   : > { %3510 = vmatmul.mubr.msk.f32.vlgmr.msra.gmra.mrb[14].mxu1 %vm574_vm3, %v1203_v50 }
 0xad2   : > { %v3504_v51 = vpop.f32.mrb[12].mxu1 }
 0xad3   : > { %v1179_v52 = vpop.f32.mrb[13].mxu1 }
 0xadd   : > { %v3511_v53 = vpop.f32.mrb[14].mxu1 }
 0xade   : > { %v1288_v54 = vadd.f32 %v3511_v53, %v4419_v43  ;;  %v1282_v55 = vpop.f32.mrb[15].mxu1 }
 0xadf   : > { %v1283_v56 = vadd.f32 %v1282_v55, %v4421_v44 }
 0xae0   : > { %v1294_v57 = vsel %vm662_vm7, %v1288_v54, -inf }
 0xae1   : > { %1295 = vmax.xlane.f32.xlu1 %v1294_v57  ;;  %v1291_v58 = vsel %vm658_vm8, %v1283_v56, -inf }
 0xae2   : > { %1292 = vmax.xlane.f32.xlu0 %v1291_v58 }
 0xaf2   : > { %977 = vrot.lane.b32.xlu1 %v4483_v11, %s4184_s14 }
 0xaf6   : > { %979 = vrot.lane.b32.xlu1 %v4481_v10, %s4184_s14 }
 0xafa   : > { %1190 = vrot.lane.b32.xlu1 %v1179_v52, %s4185_s16 }
 0xafe   : > { %1192 = vrot.lane.b32.xlu1 %v3504_v51, %s4185_s16 }
 0xb6e   : > { %v1296_v59 = vpop.xlane.xlu1 %1295 }
 0xb6f   : > { %v1298_v63 = vsub.f32 %v1288_v54, %v1296_v59  ;;  %v1293_v2 = vpop.xlane.xlu0 %1292 }
 0xb70   : > { %v1297_v3 = vsub.f32 %v1283_v56, %v1293_v2  ;;  %v396_v2 = vld [vmem:[%s4937_s3 + $0x8] sm:$0xff] }
 0xb71   : > { %v1301_v5 = vmul.f32 1.442695, %v1298_v63 }
 0xb72   : > { %v1299_v8 = vmul.f32 1.442695, %v1297_v3  ;;  %v978_v9 = vpop.permute.xlu1 %977  ;;  %v397_v3 = vld [vmem:[%s4937_s3 + $0x18] sm:$0xff] }
 0xb73   : > { %4099 = vpow2.f32 %v1301_v5  ;;  %984 = vst.msk [vmem:[#allocation3] sm:$0xff] %vm983_vm13, %v978_v9  ;;  %v3800_v5 = vpack.c.bf16 %v397_v3, %v396_v2  ;;  %v399_v9 = vld [vmem:[%s4937_s3 + $0x38] sm:$0xff] }
 0xb74   : > { %4101 = vpow2.f32 %v1299_v8  ;;  %v398_v8 = vld [vmem:[%s4937_s3 + $0x28] sm:$0xff] }
 0xb76   : > { %v980_v11 = vpop.permute.xlu1 %979 }
 0xb77   : > { %986 = vst.msk [vmem:[#allocation3 + $0x8] sm:$0xf] %vm985_vm14, %v980_v11  ;;  %v3804_v11 = vpack.c.bf16 %v399_v9, %v398_v8 }
 0xb7a   : > { %v1191_v10 = vpop.permute.xlu1 %1190 }
 0xb7b   : > { %1197 = vst.msk [vmem:[#allocation3] sm:$0xff] %vm1196_vm15, %v1191_v10  ;;  %v400_v10 = vld [vmem:[%s4938_s4] sm:$0xff] }
 0xb7d   : > { %v4100_v12 = vpop.eup %4099 }
 0xb7e   : > { %v1193_v13 = vpop.permute.xlu1 %1192  ;;  %v1306_v14 = vsel %vm662_vm7, %v4100_v12, 0.0  ;;  %v4102_v16 = vpop.eup %4101 }
 0xb7f   : > { %1199 = vst.msk [vmem:[#allocation3 + $0x8] sm:$0xf] %vm1198_vm5, %v1193_v13  ;;  %1307 = vadd.xlane.f32.xlu0 %v1306_v14  ;;  %v1303_v17 = vsel %vm658_vm8, %v4102_v16, 0.0 }
 0xb83   : > { %1304 = vadd.xlane.f32.xlu0 %v1303_v17 }
 0xb99   : > { %4006 = vrot.lane.b32.xlu0 %v4401_v34, %s4946_s17 }
 0xb9d   : > { %4011 = vrot.lane.b32.xlu0 %v4010_v62, %s4944_s18 }
 0xc0c   : > { %v1308_v18 = vpop.xlane.xlu0 %1307 }
 0xc0d   : > { %4103 = vrcp.f32 %v1308_v18 }
 0xc10   : > { %v1305_v19 = vpop.xlane.xlu0 %1304 }
 0xc11   : > { %4105 = vrcp.f32 %v1305_v19 }
 0xc14   : > { %v4007_v20 = vpop.permute.xlu0 %4006 }
 0xc15   : > { %v4009_v21 = vunpack.i.h.bf16 %v4007_v20  ;;  %v4008_v22 = vunpack.i.l.bf16 %v4007_v20 }
 0xc17   : > { %v3786_v23 = vpack.c.bf16 %v4009_v21, %v4008_v22  ;;  %v4104_v24 = vpop.eup %4103 }
 0xc18   : > { %v1312_v26 = vmul.f32 %v4104_v24, %v4100_v12  ;;  %v4012_v60 = vpop.permute.xlu0 %4011  ;;  %v401_v12 = vld [vmem:[%s4938_s4 + $0x8] sm:$0xff] }
 0xc19   : > { %3788 = vmatprep.subr.msk.bf16.mxu0 %vm4437_vm11, %v3786_v23  ;;  %v4014_v61 = vunpack.i.h.bf16 %v4012_v60  ;;  %v4013_v62 = vunpack.i.l.bf16 %v4012_v60  ;;  %v3808_v13 = vpack.c.bf16 %v401_v12, %v400_v10 }
 0xc1a   : > { %3791 = vmatpush3.bf16.msk.msra.mxu0 %vm4437_vm11, %v3786_v23 }
 0xc1b   : > { %v4106_v34 = vpop.eup %4105  ;;  %v3792_v27 = vpack.c.bf16 %v4014_v61, %v4013_v62  ;;  %3809 = vmatprep.subr.bf16.mxu0 %v3808_v13 }
 0xc1c   : > { %v1310_v25 = vmul.f32 %v4106_v34, %v4102_v16 }
 0xc1d   : > { %3793 = vmatprep.subr.bf16.mxu1 %v3792_v27 }
 0xc1e   : > { %3516 = vmatprep.mubr.msk.f32.mxu0 %vm658_vm8, %v1310_v25  ;;  %3795 = vmatpush3.bf16.msra.mxu1 %v3792_v27  ;;  %v402_v27 = vld [vmem:[%s4938_s4 + $0x10] sm:$0xff] }
 0xc1f   : > { %3517 = vmatmul.mubr.msk.f32.vlgmr.msra.gmra.mrb[2].mxu0 %vm658_vm8, %v1312_v26 }
 0xc20   : > { %3811 = vmatpush3.bf16.msra.mxu0 %v3808_v13 }
 0xcf2   : > { %v3518_v28 = vpop.f32.mrb[2].mxu0 }
 0xcf3   : > { %1405 = vrot.lane.b32.xlu1 %v3518_v28, %s4942_s19  ;;  %v1392_v31 = vpop.f32.mrb[3].mxu0  ;;  %v403_v28 = vld [vmem:[%s4938_s4 + $0x18] sm:$0xff] }
 0xcf4   : > { %1403 = vrot.lane.b32.xlu0 %v1392_v31, %s4942_s19  ;;  %v3812_v31 = vpack.c.bf16 %v403_v28, %v402_v27 }
 0xcf6   : > { %3813 = vmatprep.subr.bf16.mxu0 %v3812_v31 }
 0xcf7   : > { %1519 = vrot.lane.b32.xlu1 %v3243_v29, %s4172_s15  ;;  %3815 = vmatpush3.bf16.msra.mxu0 %v3812_v31 }
 0xcf8   : > { %4016 = vrot.lane.b32.xlu0 %v4015_v33, %s4944_s18  ;;  %v404_v33 = vld [vmem:[%s4938_s4 + $0x20] sm:$0xff] }
 0xd65   : > { %v1406_v30 = vpop.permute.xlu1 %1405 }
 0xd66   : > { %1412 = vst.msk [vmem:[#allocation3 + $0x8] sm:$0xf] %vm1411_vm6, %v1406_v30  ;;  %v1404_v32 = vpop.permute.xlu0 %1403 }
 0xd67   : > { %1410 = vst.msk [vmem:[#allocation3] sm:$0xff] %vm1409_vm9, %v1404_v32  ;;  %v406_v32 = vld [vmem:[%s4938_s4 + $0x30] sm:$0xff] }
 0xd69   : > { %v1520_v41 = vpop.permute.xlu1 %1519 }
 0xd6a   : > { %v4017_v35 = vpop.permute.xlu0 %4016 }
 0xd6b   : > { %v4019_v36 = vunpack.i.h.bf16 %v4017_v35  ;;  %v4018_v37 = vunpack.i.l.bf16 %v4017_v35  ;;  %v407_v35 = vld [vmem:[%s4938_s4 + $0x38] sm:$0xff] }
 0xd6d   : > { %v3796_v0 = vpack.c.bf16 %v4019_v36, %v4018_v37  ;;  %v1414_v39 = vld [vmem:[#allocation3 + $0x8] sm:$0xf]  ;;  %v408_v36 = vld [vmem:[%s4938_s4 + $0x40] sm:$0xff]  ;;  %v3820_v37 = vpack.c.bf16 %v407_v35, %v406_v32  ;;  %v4658_v35 = vld [vmem:[%s4937_s3 + $0x50] sm:$0xff] }
 0xd6e   : > { %v1413_v1 = vld [vmem:[#allocation3] sm:$0xff]  ;;  %v4653_v32 = vld [vmem:[%s4937_s3 + $0x40] sm:$0xff] }
 0xd6f   : > { %3797 = vmatprep.subr.bf16.mxu1 %v3796_v0  ;;  %3527 = vmatprep.mubr.msk.f32.mxu1 %vm274_vm0, %v1413_v1 }
 0xd70   : > { %3799 = vmatpush3.bf16.msra.mxu1 %v3796_v0  ;;  %v409_v0 = vld [vmem:[%s4938_s4 + $0x48] sm:$0xff] }
 0xd71   : > { %3801 = vmatprep.subr.bf16.mxu1 %v3800_v5  ;;  %v3824_v1 = vpack.c.bf16 %v409_v0, %v408_v36  ;;  %v3272_v36 = vld [vmem:[%s4939_s5 + $0x1] ss:$0 sm:$0xff] }
 0xd72   : > { %v4669_v0 = vld [vmem:[%s4937_s3 + $0x60] sm:$0xff] }
 0xd73   : > { %3528 = vmatmul.mubr.msk.f32.vlgmr.msra.gmra.mrb[16].mxu1 %vm274_vm0, %v1414_v39  ;;  %v410_v39 = vld [vmem:[%s4938_s4 + $0x50] sm:$0xff] }
 0xd74   : > { %3803 = vmatpush3.bf16.msra.mxu1 %v3800_v5 }
 0xd75   : > { %3805 = vmatprep.subr.bf16.mxu1 %v3804_v11 }
 0xd78   : > { %3807 = vmatpush3.bf16.msra.mxu1 %v3804_v11 }
 0xe46   : > { %v3529_v40 = vpop.f32.mrb[16].mxu1 }
 0xe47   : > { %v1513_v42 = vadd.f32 %v3529_v40, %v4334_v46  ;;  %v1503_v47 = vpop.f32.mrb[17].mxu1  ;;  %v411_v40 = vld [vmem:[%s4938_s4 + $0x58] sm:$0xff] }
 0xe48   : > { %v1512_v48 = vadd.f32 %v1503_v47, %v4332_v45  ;;  %v413_v47 = vld [vmem:[%s4938_s4 + $0x68] sm:$0xff] }
 0xe49   : > { %v4554_v49 = vadd.f32 %v1520_v41, %v1513_v42  ;;  %v412_v42 = vld [vmem:[%s4938_s4 + $0x60] sm:$0xff] }
 0xe4a   : > { %v4556_v50 = vadd.f32 %v1520_v41, %v1512_v48  ;;  %v3828_v41 = vpack.c.bf16 %v411_v40, %v410_v39  ;;  %v3832_v48 = vpack.c.bf16 %v413_v47, %v412_v42  ;;  %v1773_v40 = vld [vmem:[%s4939_s5 + $0x1] sm:$0x11] }
 0xe4b   : > { %v1527_v51 = vsel %vm276_vm1, %v4554_v49, 0.0  ;;  %v1823_v42 = vrot.slane %v1773_v40, %v467_v7 }
 0xe4c   : > { %1528 = vadd.xlane.f32.xlu1 %v1527_v51  ;;  %v1524_v52 = vsel %vm274_vm0, %v4556_v50, 0.0  ;;  %v414_v51 = vld [vmem:[%s4938_s4 + $0x70] sm:$0xff] }
 0xe4d   : > { %1525 = vadd.xlane.f32.xlu0 %v1524_v52  ;;  %v415_v52 = vld [vmem:[%s4938_s4 + $0x78] sm:$0xff] }
 0xe5d   : > { %1555 = vrot.lane.b32.xlu1 %v3243_v29, %s4944_s18 }
 0xed9   : > { %v1529_v53 = vpop.xlane.xlu1 %1528 }
 0xeda   : > { %v1531_v54 = vmul.f32 0.03125, %v1529_v53  ;;  %v1526_v46 = vpop.xlane.xlu0 %1525  ;;  %v3836_v53 = vpack.c.bf16 %v415_v52, %v414_v51 }
 0xedb   : > { %v1530_v55 = vmul.f32 0.03125, %v1526_v46 }
 0xedc   : > { %v1533_v45 = vsub.f32 %v4554_v49, %v1531_v54  ;;  %v3244_v54 = vld [vmem:[%s4939_s5 + $0x8] ss:$0 sm:$0xff] }
 0xedd   : > { %v1532_v56 = vsub.f32 %v4556_v50, %v1530_v55  ;;  %v1556_v60 = vpop.permute.xlu1 %1555 }
 0xede   : > { %v1535_v57 = vmul.f32 %v1533_v45, %v1533_v45 }
 0xedf   : > { %v1534_v59 = vmul.f32 %v1532_v56, %v1532_v56 }
 0xee0   : > { %v1539_v58 = vsel %vm276_vm1, %v1535_v57, 0.0 }
 0xee1   : > { %1540 = vadd.xlane.f32.xlu0 %v1539_v58  ;;  %v1536_v63 = vsel %vm274_vm0, %v1534_v59, 0.0 }
 0xee5   : > { %1537 = vadd.xlane.f32.xlu0 %v1536_v63 }
 0xefb   : > { %1550 = vrot.lane.b32.xlu0 %v3243_v29, %s4173_s28  ;;  %v405_v29 = vld [vmem:[%s4938_s4 + $0x28] sm:$0xff] }
 0xefc   : > { %v3816_v30 = vpack.c.bf16 %v405_v29, %v404_v33 }
 0xefe   : > { %3817 = vmatprep.subr.bf16.mxu0 %v3816_v30 }
 0xeff   : > { %3819 = vmatpush3.bf16.msra.mxu0 %v3816_v30 }
 0xf00   : > { %3821 = vmatprep.subr.bf16.mxu0 %v3820_v37 }
 0xf03   : > { %3823 = vmatpush3.bf16.msra.mxu0 %v3820_v37  ;;  %v3840_v37 = vpack.c.bf16 %v4658_v35, %v4653_v32 }
 0xf04   : > { %3825 = vmatprep.subr.bf16.mxu0 %v3824_v1 }
 0xf05   : > { %3841 = vmatprep.subr.bf16.mxu1 %v3840_v37 }
 0xf07   : > { %3827 = vmatpush3.bf16.msra.mxu0 %v3824_v1  ;;  %v4674_v1 = vld [vmem:[%s4937_s3 + $0x70] sm:$0xff] }
 0xf08   : > { %3829 = vmatprep.subr.bf16.mxu0 %v3828_v41  ;;  %v3844_v39 = vpack.c.bf16 %v4674_v1, %v4669_v0  ;;  %v4065_v15 = vpack.i.bf16 %v4674_v1, %v4669_v0 }
 0xf0b   : > { %3831 = vmatpush3.bf16.msra.mxu0 %v3828_v41  ;;  %v1819_v41 = vrot.slane %v1773_v40, %v4380_v6 }
 0xf0c   : > { %3833 = vmatprep.subr.bf16.mxu0 %v3832_v48 }
 0xf0d   : > { %v1829_v47 = vrot.slane %v1819_v41, %v4380_v6 }
 0xf0f   : > { %3835 = vmatpush3.bf16.msra.mxu0 %v3832_v48  ;;  %v1833_v48 = vrot.slane %v1823_v42, %v4380_v6 }
 0xf10   : > { %3837 = vmatprep.subr.bf16.mxu0 %v3836_v53 }
 0xf13   : > { %3839 = vmatpush3.bf16.msra.mxu0 %v3836_v53 }
 0xf6e   : > { %v1541_v14 = vpop.xlane.xlu0 %1540 }
 0xf6f   : > { %v1543_v16 = vmul.f32 0.03125, %v1541_v14 }
 0xf71   : > { %v1545_v17 = vadd.f32 1e-05, %v1543_v16 }
 0xf72   : > { %v1538_v18 = vpop.xlane.xlu0 %1537 }
 0xf73   : > { %4107 = vrsqrt.f32 %v1545_v17  ;;  %v1542_v19 = vmul.f32 0.03125, %v1538_v18 }
 0xf75   : > { %v1544_v20 = vadd.f32 1e-05, %v1542_v19 }
 0xf76   : > { %v1551_v23 = vpop.permute.xlu0 %1550 }
 0xf77   : > { %4109 = vrsqrt.f32 %v1544_v20  ;;  %v3247_v20 = vld [vmem:[%s4939_s5 + $0xc] ss:$0 sm:$0xff] }
 0xf7d   : > { %v4108_v21 = vpop.eup %4107 }
 0xf7e   : > { %v1549_v22 = vmul.f32 %v4108_v21, %v1533_v45 }
 0xf80   : > { %v1554_v25 = vmul.f32 %v1551_v23, %v1549_v22 }
 0xf81   : > { %v4110_v24 = vpop.eup %4109 }
 0xf82   : > { %v1548_v34 = vmul.f32 %v4110_v24, %v1532_v56  ;;  %v1559_v62 = vadd.f32 %v1556_v60, %v1554_v25 }
 0xf84   : > { %v1553_v26 = vmul.f32 %v1551_v23, %v1548_v34 }
 0xf86   : > { %v1558_v61 = vadd.f32 %v1556_v60, %v1553_v26 }
 0xf88   : > { %3538 = vmatprep.mubr.msk.f32.mxu1 %vm274_vm0, %v1558_v61 }
 0xf89   : > { %3539 = vmatmul.mubr.msk.f32.vlgmr.msra.gmra.mrb[18].mxu1 %vm274_vm0, %v1559_v62 }
 0xf8a   : > { %3843 = vmatpush3.bf16.msra.mxu1 %v3840_v37 }
 0xf8b   : > { %3845 = vmatprep.subr.bf16.mxu1 %v3844_v39 }
 0xf8e   : > { %3847 = vmatpush3.bf16.msra.mxu1 %v3844_v39 }
0x105c   : > { %v3540_v46 = vpop.f32.mrb[18].mxu1 }
0x105d   : > { %v1642_v55 = vadd.f32 %v3540_v46, %v3244_v54  ;;  %v1636_v45 = vpop.f32.mrb[19].mxu1 }
0x105e   : > { %v1637_v56 = vadd.f32 %v3244_v54, %v1636_v45 }
0x105f   : > { %v1648_v57 = vmul.f32 0.044715, %v1642_v55  ;;  %v1646_v17 = vmul.f32 0.5, %v1642_v55 }
0x1060   : > { %v1647_v58 = vmul.f32 0.044715, %v1637_v56  ;;  %v1645_v14 = vmul.f32 0.5, %v1637_v56 }
0x1061   : > { %v1650_v59 = vmul.f32 %v1648_v57, %v1642_v55 }
0x1062   : > { %v1649_v63 = vmul.f32 %v1647_v58, %v1637_v56 }
0x1063   : > { %v1652_v2 = vmul.f32 %v1650_v59, %v1642_v55 }
0x1064   : > { %v1651_v3 = vmul.f32 %v1649_v63, %v1637_v56 }
0x1065   : > { %v1654_v5 = vadd.f32 %v1652_v2, %v1642_v55 }
0x1066   : > { %v1653_v8 = vadd.f32 %v1651_v3, %v1637_v56 }
0x1067   : > { %v1656_v9 = vmul.f32 0.7978845, %v1654_v5 }
0x1068   : > { %v1655_v11 = vmul.f32 0.7978845, %v1653_v8 }
0x1069   : > { %4111 = vtanh.f32 %v1656_v9 }
0x106a   : > { %4113 = vtanh.f32 %v1655_v11 }
0x1073   : > { %v4112_v10 = vpop.eup %4111 }
0x1074   : > { %v4114_v12 = vpop.eup %4113  ;;  %v1660_v13 = vadd.f32 1.0, %v4112_v10 }
0x1075   : > { %v1659_v16 = vadd.f32 1.0, %v4114_v12 }
0x1076   : > { %v1662_v19 = vmul.f32 %v1660_v13, %v1646_v17 }
0x1077   : > { %v1661_v18 = vmul.f32 %v1659_v16, %v1645_v14 }
0x1079   : > { %3573 = vmatprep.mubr.f32.mxu0 %v1661_v18 }
0x107a   : > { %3574 = vmatmul.mubr.f32.vlgmr.msra.gmra.mrb[4].mxu0 %v1662_v19 }
0x114d   : > { %v3575_v21 = vpop.f32.mrb[4].mxu0 }
0x114e   : > { %v1739_v22 = vadd.f32 %v3575_v21, %v4554_v49  ;;  %v1729_v23 = vpop.f32.mrb[5].mxu0 }
0x114f   : > { %v1738_v24 = vadd.f32 %v1729_v23, %v4556_v50 }
0x1150   : > { %v4638_v34 = vadd.f32 %v3247_v20, %v1739_v22 }
0x1151   : > { %v4640_v25 = vadd.f32 %v3247_v20, %v1738_v24 }
0x1152   : > { %v1780_v26 = vsel %vm276_vm1, %v4638_v34, 0.0 }
0x1153   : > { %1781 = vadd.xlane.f32.xlu0 %v1780_v26  ;;  %v1777_v60 = vsel %vm274_vm0, %v4640_v25, 0.0 }
0x1154   : > { %1778 = vadd.xlane.f32.xlu1 %v1777_v60 }
0x11e0   : > { %v1782_v61 = vpop.xlane.xlu0 %1781 }
0x11e1   : > { %v1784_v62 = vmul.f32 0.03125, %v1782_v61  ;;  %v1779_v27 = vpop.xlane.xlu1 %1778 }
0x11e2   : > { %v1783_v28 = vmul.f32 0.03125, %v1779_v27 }
0x11e3   : > { %v1786_v49 = vsub.f32 %v4638_v34, %v1784_v62 }
0x11e4   : > { %v1785_v50 = vsub.f32 %v4640_v25, %v1783_v28 }
0x11e5   : > { %v1788_v31 = vmul.f32 %v1786_v49, %v1786_v49 }
0x11e6   : > { %v1787_v33 = vmul.f32 %v1785_v50, %v1785_v50 }
0x11e7   : > { %v1792_v29 = vsel %vm276_vm1, %v1788_v31, 0.0 }
0x11e8   : > { %1793 = vadd.xlane.f32.xlu1 %v1792_v29  ;;  %v1789_v30 = vsel %vm274_vm0, %v1787_v33, 0.0 }
0x11e9   : > { %1790 = vadd.xlane.f32.xlu0 %v1789_v30 }
0x11f9   : > { %1836 = vrot.lane.b32.xlu1 %v1829_v47, %s4173_s28 }
0x11fd   : > { %1838 = vrot.lane.b32.xlu1 %v1833_v48, %s4173_s28 }
0x11ff   : > { %1810 = vrot.lane.b32.xlu0 %v3272_v36, %s4172_s15 }
0x1275   : > { %v1794_v51 = vpop.xlane.xlu1 %1793 }
0x1276   : > { %v1796_v52 = vmul.f32 0.03125, %v1794_v51  ;;  %v1791_v53 = vpop.xlane.xlu0 %1790 }
0x1277   : > { %v1795_v54 = vmul.f32 0.03125, %v1791_v53 }
0x1278   : > { %v1798_v46 = vadd.f32 1e-05, %v1796_v52 }
0x1279   : > { %v1797_v55 = vadd.f32 1e-05, %v1795_v54  ;;  %v1837_v6 = vpop.permute.xlu1 %1836 }
0x127a   : > { %4115 = vrsqrt.f32 %v1798_v46  ;;  %v1811_v57 = vpop.permute.xlu0 %1810 }
0x127b   : > { %4117 = vrsqrt.f32 %v1797_v55 }
0x127d   : > { %v1839_v3 = vpop.permute.xlu1 %1838 }
0x127e   : > { %v1840_v5 = vsel %vm306_vm2, %v1837_v6, %v1839_v3 }
0x1284   : > { %v4116_v45 = vpop.eup %4115 }
0x1285   : > { %v4118_v56 = vpop.eup %4117  ;;  %v1802_v4 = vmul.f32 %v4116_v45, %v1786_v49 }
0x1286   : > { %v1801_v7 = vmul.f32 %v4118_v56, %v1785_v50 }
0x1287   : > { %v1808_v58 = vmul.f32 %v3272_v36, %v1802_v4 }
0x1288   : > { %v1807_v59 = vmul.f32 %v3272_v36, %v1801_v7 }
0x1289   : > { %v1814_v2 = vadd.f32 %v1811_v57, %v1808_v58 }
0x128a   : > { %v1813_v63 = vadd.f32 %v1811_v57, %v1807_v59 }
0x128c   : > { %3584 = vmatprep.mubr.msk.f32.mxu1 %vm274_vm0, %v1813_v63 }
0x128d   : > { %3585 = vmatmul.mubr.msk.f32.vlgmr.msra.gmra.mrb[20].mxu1 %vm274_vm0, %v1814_v2 }
0x1360   : > { %v3586_v8 = vpop.f32.mrb[20].mxu1 }
0x1361   : > { %v4691_v9 = vadd.f32 %v3586_v8, %v1840_v5  ;;  %v1914_v11 = vpop.f32.mrb[21].mxu1 }
0x1362   : > { %v4693_v10 = vadd.f32 %v1914_v11, %v1840_v5 }
0x1364   : > { %3591 = vmatprep.mubr.msk.f32.mxu1 %vm574_vm3, %v4693_v10  ;;  %v4699_v12 = vpack.i.bf16 %v4691_v9, %v4693_v10 }
0x1366   : > { %4021 = vrot.lane.b32.xlu1 %v4699_v12, %s4172_s15 }
0x13d8   : > { %v4022_v13 = vpop.permute.xlu1 %4021 }
0x13d9   : > { %v4024_v14 = vunpack.i.h.bf16 %v4022_v13  ;;  %v4023_v16 = vunpack.i.l.bf16 %v4022_v13 }
0x13db   : > { %v3848_v17 = vpack.c.bf16 %v4024_v14, %v4023_v16 }
0x13dd   : > { %3850 = vmatprep.subr.msk.bf16.mxu1 %vm4407_vm4, %v3848_v17 }
0x13de   : > { %3853 = vmatpush3.bf16.xpose.msk.msra.mxu1 %vm4407_vm4, %v3848_v17 }
0x13e5   : > { %3592 = vmatmul.mubr.msk.f32.vlgmr.msra.gmra.mrb[22].mxu1 %vm574_vm3, %v4691_v9 }
0x14b8   : > { %v3593_v18 = vpop.f32.mrb[22].mxu1 }
0x14b9   : > { %v2009_v19 = vadd.f32 %v3593_v18, %v4419_v43  ;;  %v2003_v20 = vpop.f32.mrb[23].mxu1 }
0x14ba   : > { %v2004_v21 = vadd.f32 %v2003_v20, %v4421_v44 }
0x14bb   : > { %v2015_v22 = vsel %vm662_vm7, %v2009_v19, -inf }
0x14bc   : > { %2016 = vmax.xlane.f32.xlu1 %v2015_v22  ;;  %v2012_v23 = vsel %vm658_vm8, %v2004_v21, -inf }
0x14bd   : > { %2013 = vmax.xlane.f32.xlu0 %v2012_v23 }
0x14cd   : > { %4031 = vrot.lane.b32.xlu1 %v4699_v12, %s4175_s29  ;;  %s4951_s29 = smov 40  }
0x14d1   : > { %2124 = vrot.lane.b32.xlu1 %v4693_v10, %s4176_s30 }
0x14d5   : > { %2126 = vrot.lane.b32.xlu1 %v4691_v9, %s4176_s30  ;;  %s4952_s30 = smov 32  }
0x1549   : > { %v2017_v24 = vpop.xlane.xlu1 %2016 }
0x154a   : > { %v2019_v26 = vsub.f32 %v2009_v19, %v2017_v24  ;;  %v2014_v60 = vpop.xlane.xlu0 %2013 }
0x154b   : > { %v2018_v61 = vsub.f32 %v2004_v21, %v2014_v60 }
0x154c   : > { %v2022_v62 = vmul.f32 1.442695, %v2019_v26 }
0x154d   : > { %v2020_v27 = vmul.f32 1.442695, %v2018_v61  ;;  %v4032_v30 = vpop.permute.xlu1 %4031 }
0x154e   : > { %4119 = vpow2.f32 %v2022_v62  ;;  %v4034_v37 = vunpack.i.h.bf16 %v4032_v30  ;;  %v4033_v39 = vunpack.i.l.bf16 %v4032_v30 }
0x154f   : > { %4121 = vpow2.f32 %v2020_v27 }
0x1550   : > { %v3860_v47 = vpack.c.bf16 %v4034_v37, %v4033_v39 }
0x1551   : > { %v2125_v54 = vpop.permute.xlu1 %2124 }
0x1555   : > { %v2127_v46 = vpop.permute.xlu1 %2126 }
0x1558   : > { %v4120_v28 = vpop.eup %4119 }
0x1559   : > { %v2027_v49 = vsel %vm662_vm7, %v4120_v28, 0.0  ;;  %v4122_v50 = vpop.eup %4121 }
0x155a   : > { %2028 = vadd.xlane.f32.xlu0 %v2027_v49  ;;  %v2024_v31 = vsel %vm658_vm8, %v4122_v50, 0.0 }
0x155e   : > { %2025 = vadd.xlane.f32.xlu0 %v2024_v31 }
0x1574   : > { %4026 = vrot.lane.b32.xlu0 %v4699_v12, %s4173_s28 }
0x15e7   : > { %v2029_v33 = vpop.xlane.xlu0 %2028 }
0x15e8   : > { %4123 = vrcp.f32 %v2029_v33 }
0x15eb   : > { %v2026_v29 = vpop.xlane.xlu0 %2025 }
0x15ec   : > { %4125 = vrcp.f32 %v2026_v29 }
0x15ef   : > { %v4027_v36 = vpop.permute.xlu0 %4026 }
0x15f0   : > { %v4029_v40 = vunpack.i.h.bf16 %v4027_v36  ;;  %v4028_v41 = vunpack.i.l.bf16 %v4027_v36 }
0x15f2   : > { %v3854_v42 = vpack.c.bf16 %v4029_v40, %v4028_v41  ;;  %v4124_v48 = vpop.eup %4123 }
0x15f3   : > { %v2033_v53 = vmul.f32 %v4124_v48, %v4120_v28 }
0x15f4   : > { %3856 = vmatprep.subr.msk.bf16.mxu1 %vm4437_vm11, %v3854_v42 }
0x15f5   : > { %3859 = vmatpush3.bf16.msk.msra.mxu1 %vm4437_vm11, %v3854_v42 }
0x15f6   : > { %v4126_v51 = vpop.eup %4125  ;;  %3862 = vmatprep.subr.msk.bf16.mxu1 %vm4407_vm4, %v3860_v47 }
0x15f7   : > { %v2031_v52 = vmul.f32 %v4126_v51, %v4122_v50 }
0x15f9   : > { %3598 = vmatprep.mubr.msk.f32.mxu1 %vm658_vm8, %v2031_v52 }
0x15fa   : > { %3599 = vmatmul.mubr.msk.f32.vlgmr.msra.gmra.mrb[24].mxu1 %vm658_vm8, %v2033_v53 }
0x15fb   : > { %3605 = vmatprep.mubr.msk.f32.mxu1 %vm574_vm3, %v2125_v54 }
0x15fe   : > { %3865 = vmatpush3.bf16.xpose.msk.msra.mxu1 %vm4407_vm4, %v3860_v47 }
0x1605   : > { %3606 = vmatmul.mubr.msk.f32.vlgmr.msra.gmra.mrb[26].mxu1 %vm574_vm3, %v2127_v46 }
0x16cd   : > { %v3600_v55 = vpop.f32.mrb[24].mxu1 }
0x16ce   : > { %2123 = vst.msk [vmem:[#allocation3 + $0x8] sm:$0xf] %vm772_vm12, %v3600_v55  ;;  %v2113_v45 = vpop.f32.mrb[25].mxu1 }
0x16cf   : > { %2122 = vst.msk [vmem:[#allocation3] sm:$0xff] %vm574_vm3, %v2113_v45 }
0x16d8   : > { %v3607_v56 = vpop.f32.mrb[26].mxu1 }
0x16d9   : > { %v2212_v4 = vadd.f32 %v3607_v56, %v4419_v43  ;;  %v2206_v7 = vpop.f32.mrb[27].mxu1 }
0x16da   : > { %v2207_v57 = vadd.f32 %v2206_v7, %v4421_v44 }
0x16db   : > { %v2218_v58 = vsel %vm662_vm7, %v2212_v4, -inf }
0x16dc   : > { %2219 = vmax.xlane.f32.xlu1 %v2218_v58  ;;  %v2215_v59 = vsel %vm658_vm8, %v2207_v57, -inf }
0x16dd   : > { %2216 = vmax.xlane.f32.xlu0 %v2215_v59 }
0x16ed   : > { %4041 = vrot.lane.b32.xlu1 %v4699_v12, %s4178_s7  ;;  %s4953_s7 = smov 24  }
0x16f1   : > { %2335 = vrot.lane.b32.xlu1 %v4693_v10, %s4179_s8 }
0x16f5   : > { %2337 = vrot.lane.b32.xlu1 %v4691_v9, %s4179_s8 }
0x1769   : > { %v2220_v63 = vpop.xlane.xlu1 %2219 }
0x176a   : > { %v2222_v2 = vsub.f32 %v2212_v4, %v2220_v63  ;;  %v2217_v6 = vpop.xlane.xlu0 %2216 }
0x176b   : > { %v2221_v3 = vsub.f32 %v2207_v57, %v2217_v6 }
0x176c   : > { %v2225_v5 = vmul.f32 1.442695, %v2222_v2 }
0x176d   : > { %v2223_v8 = vmul.f32 1.442695, %v2221_v3  ;;  %v4042_v19 = vpop.permute.xlu1 %4041 }
0x176e   : > { %4127 = vpow2.f32 %v2225_v5  ;;  %v4044_v21 = vunpack.i.h.bf16 %v4042_v19  ;;  %v4043_v22 = vunpack.i.l.bf16 %v4042_v19 }
0x176f   : > { %4129 = vpow2.f32 %v2223_v8 }
0x1770   : > { %v3872_v60 = vpack.c.bf16 %v4044_v21, %v4043_v22 }
0x1771   : > { %v2336_v49 = vpop.permute.xlu1 %2335 }
0x1775   : > { %v2338_v50 = vpop.permute.xlu1 %2337 }
0x1778   : > { %v4128_v11 = vpop.eup %4127 }
0x1779   : > { %v2230_v13 = vsel %vm662_vm7, %v4128_v11, 0.0  ;;  %v4130_v14 = vpop.eup %4129 }
0x177a   : > { %2231 = vadd.xlane.f32.xlu0 %v2230_v13  ;;  %v2227_v16 = vsel %vm658_vm8, %v4130_v14, 0.0 }
0x177e   : > { %2228 = vadd.xlane.f32.xlu0 %v2227_v16 }
0x1794   : > { %4036 = vrot.lane.b32.xlu0 %v4699_v12, %s4180_s9 }
0x1807   : > { %v2232_v17 = vpop.xlane.xlu0 %2231 }
0x1808   : > { %4131 = vrcp.f32 %v2232_v17 }
0x180b   : > { %v2229_v18 = vpop.xlane.xlu0 %2228 }
0x180c   : > { %4133 = vrcp.f32 %v2229_v18 }
0x180f   : > { %v4037_v20 = vpop.permute.xlu0 %4036 }
0x1810   : > { %v4039_v23 = vunpack.i.h.bf16 %v4037_v20  ;;  %v4038_v24 = vunpack.i.l.bf16 %v4037_v20 }
0x1812   : > { %v3866_v26 = vpack.c.bf16 %v4039_v23, %v4038_v24  ;;  %v4132_v61 = vpop.eup %4131 }
0x1813   : > { %v2236_v28 = vmul.f32 %v4132_v61, %v4128_v11 }
0x1814   : > { %3868 = vmatprep.subr.msk.bf16.mxu1 %vm4437_vm11, %v3866_v26 }
0x1815   : > { %3871 = vmatpush3.bf16.msk.msra.mxu1 %vm4437_vm11, %v3866_v26 }
0x1816   : > { %v4134_v62 = vpop.eup %4133  ;;  %3874 = vmatprep.subr.msk.bf16.mxu1 %vm4407_vm4, %v3872_v60 }
0x1817   : > { %v2234_v27 = vmul.f32 %v4134_v62, %v4130_v14 }
0x1819   : > { %3612 = vmatprep.mubr.msk.f32.mxu1 %vm658_vm8, %v2234_v27 }
0x181a   : > { %3613 = vmatmul.mubr.msk.f32.vlgmr.msra.gmra.mrb[28].mxu1 %vm658_vm8, %v2236_v28 }
0x181b   : > { %3619 = vmatprep.mubr.msk.f32.mxu1 %vm574_vm3, %v2336_v49 }
0x181e   : > { %3877 = vmatpush3.bf16.xpose.msk.msra.mxu1 %vm4407_vm4, %v3872_v60 }
0x1825   : > { %3620 = vmatmul.mubr.msk.f32.vlgmr.msra.gmra.mrb[30].mxu1 %vm574_vm3, %v2338_v50 }
0x18ed   : > { %v4763_v31 = vpop.f32.mrb[28].mxu1 }
0x18ee   : > { %v2316_v33 = vpop.f32.mrb[29].mxu1 }
0x18f8   : > { %v3621_v29 = vpop.f32.mrb[30].mxu1 }
0x18f9   : > { %v2423_v30 = vadd.f32 %v3621_v29, %v4419_v43  ;;  %v2417_v36 = vpop.f32.mrb[31].mxu1 }
0x18fa   : > { %v2418_v37 = vadd.f32 %v2417_v36, %v4421_v44 }
0x18fb   : > { %v2429_v39 = vsel %vm662_vm7, %v2423_v30, -inf }
0x18fc   : > { %2430 = vmax.xlane.f32.xlu1 %v2429_v39  ;;  %v2426_v40 = vsel %vm658_vm8, %v2418_v37, -inf }
0x18fd   : > { %2427 = vmax.xlane.f32.xlu0 %v2426_v40 }
0x190d   : > { %4051 = vrot.lane.b32.xlu1 %v4699_v12, %s4181_s10 }
0x1911   : > { %2546 = vrot.lane.b32.xlu1 %v4693_v10, %s4182_s12 }
0x1915   : > { %2548 = vrot.lane.b32.xlu1 %v4691_v9, %s4182_s12 }
0x1989   : > { %v2431_v41 = vpop.xlane.xlu1 %2430 }
0x198a   : > { %v2433_v42 = vsub.f32 %v2423_v30, %v2431_v41  ;;  %v2428_v47 = vpop.xlane.xlu0 %2427 }
0x198b   : > { %v2432_v48 = vsub.f32 %v2418_v37, %v2428_v47 }
0x198c   : > { %v2436_v51 = vmul.f32 1.442695, %v2433_v42 }
0x198d   : > { %v2434_v52 = vmul.f32 1.442695, %v2432_v48  ;;  %v4052_v45 = vpop.permute.xlu1 %4051 }
0x198e   : > { %4135 = vpow2.f32 %v2436_v51  ;;  %v4054_v4 = vunpack.i.h.bf16 %v4052_v45  ;;  %v4053_v7 = vunpack.i.l.bf16 %v4052_v45 }
0x198f   : > { %4137 = vpow2.f32 %v2434_v52 }
0x1990   : > { %v3884_v63 = vpack.c.bf16 %v4054_v4, %v4053_v7 }
0x1991   : > { %v2547_v8 = vpop.permute.xlu1 %2546 }
0x1995   : > { %v2549_v11 = vpop.permute.xlu1 %2548 }
0x1998   : > { %v4136_v53 = vpop.eup %4135 }
0x1999   : > { %v2441_v54 = vsel %vm662_vm7, %v4136_v53, 0.0  ;;  %v4138_v46 = vpop.eup %4137 }
0x199a   : > { %2442 = vadd.xlane.f32.xlu0 %v2441_v54  ;;  %v2438_v55 = vsel %vm658_vm8, %v4138_v46, 0.0 }
0x199e   : > { %2439 = vadd.xlane.f32.xlu0 %v2438_v55 }
0x19b4   : > { %4046 = vrot.lane.b32.xlu0 %v4699_v12, %s4183_s13 }
0x1a27   : > { %v2443_v9 = vpop.xlane.xlu0 %2442 }
0x1a28   : > { %4139 = vrcp.f32 %v2443_v9 }
0x1a2b   : > { %v2440_v10 = vpop.xlane.xlu0 %2439 }
0x1a2c   : > { %4141 = vrcp.f32 %v2440_v10 }
0x1a2f   : > { %v4047_v56 = vpop.permute.xlu0 %4046 }
0x1a30   : > { %v4049_v57 = vunpack.i.h.bf16 %v4047_v56  ;;  %v4048_v58 = vunpack.i.l.bf16 %v4047_v56 }
0x1a32   : > { %v3878_v59 = vpack.c.bf16 %v4049_v57, %v4048_v58  ;;  %v4140_v2 = vpop.eup %4139 }
0x1a33   : > { %v2447_v5 = vmul.f32 %v4140_v2, %v4136_v53  ;;  %v3305_v53 = vld [vmem:[%s4939_s5 + $0x5] ss:$0 sm:$0xff] }
0x1a34   : > { %3880 = vmatprep.subr.msk.bf16.mxu1 %vm4437_vm11, %v3878_v59 }
0x1a35   : > { %3883 = vmatpush3.bf16.msk.msra.mxu1 %vm4437_vm11, %v3878_v59 }
0x1a36   : > { %v4142_v6 = vpop.eup %4141  ;;  %3886 = vmatprep.subr.msk.bf16.mxu1 %vm4407_vm4, %v3884_v63 }
0x1a37   : > { %v2445_v3 = vmul.f32 %v4142_v6, %v4138_v46 }
0x1a39   : > { %3626 = vmatprep.mubr.msk.f32.mxu1 %vm658_vm8, %v2445_v3 }
0x1a3a   : > { %3627 = vmatmul.mubr.msk.f32.vlgmr.msra.gmra.mrb[32].mxu1 %vm658_vm8, %v2447_v5 }
0x1a3b   : > { %3633 = vmatprep.mubr.msk.f32.mxu1 %vm574_vm3, %v2547_v8 }
0x1a3e   : > { %3889 = vmatpush3.bf16.xpose.msk.msra.mxu1 %vm4407_vm4, %v3884_v63 }
0x1a45   : > { %3634 = vmatmul.mubr.msk.f32.vlgmr.msra.gmra.mrb[34].mxu1 %vm574_vm3, %v2549_v11 }
0x1b0d   : > { %v3628_v13 = vpop.f32.mrb[32].mxu1 }
0x1b0e   : > { %v2527_v14 = vpop.f32.mrb[33].mxu1 }
0x1b18   : > { %v3635_v16 = vpop.f32.mrb[34].mxu1 }
0x1b19   : > { %v2634_v17 = vadd.f32 %v3635_v16, %v4419_v43  ;;  %v2628_v18 = vpop.f32.mrb[35].mxu1 }
0x1b1a   : > { %v2629_v19 = vadd.f32 %v2628_v18, %v4421_v44  ;;  %v3252_v18 = vld [vmem:[%s4937_s3 + $0x48] sm:$0xff] }
0x1b1b   : > { %v2640_v20 = vsel %vm662_vm7, %v2634_v17, -inf }
0x1b1c   : > { %2641 = vmax.xlane.f32.xlu1 %v2640_v20  ;;  %v2637_v21 = vsel %vm658_vm8, %v2629_v19, -inf }
0x1b1d   : > { %2638 = vmax.xlane.f32.xlu0 %v2637_v21  ;;  %v3254_v21 = vld [vmem:[%s4937_s3 + $0x68] sm:$0xff] }
0x1b2d   : > { %2327 = vrot.lane.b32.xlu1 %v2316_v33, %s4184_s14 }
0x1b31   : > { %2329 = vrot.lane.b32.xlu1 %v4763_v31, %s4184_s14  ;;  %v4060_v31 = vpack.i.bf16 %v4658_v35, %v4653_v32 }
0x1b35   : > { %2538 = vrot.lane.b32.xlu1 %v2527_v14, %s4185_s16 }
0x1b39   : > { %2540 = vrot.lane.b32.xlu1 %v3628_v13, %s4185_s16  ;;  %s4954_s16 = sshll.u32 %s4956_s22, 4 }
0x1b3a   : > { %s271_s26 = scalar_lea.vmem %s4940_s6, %s4954_s16 }
0x1ba9   : > { %v2642_v38 = vpop.xlane.xlu1 %2641 }
0x1baa   : > { %v2644_v43 = vsub.f32 %v2634_v17, %v2642_v38  ;;  %v2639_v22 = vpop.xlane.xlu0 %2638  ;;  %v3255_v38 = vld [vmem:[%s4937_s3 + $0x78] sm:$0xff] }
0x1bab   : > { %v2643_v23 = vsub.f32 %v2629_v19, %v2639_v22  ;;  %v3253_v19 = vld [vmem:[%s4937_s3 + $0x58] sm:$0xff]  ;;  %v3256_v22 = vld [vmem:[%s4938_s4 + $0x80] sm:$0xff] }
0x1bac   : > { %v2647_v44 = vmul.f32 1.442695, %v2644_v43  ;;  %v3904_v20 = vpack.c.bf16 %v3253_v19, %v3252_v18  ;;  %v3908_v43 = vpack.c.bf16 %v3255_v38, %v3254_v21 }
0x1bad   : > { %v2645_v24 = vmul.f32 1.442695, %v2643_v23  ;;  %v2328_v26 = vpop.permute.xlu1 %2327  ;;  %v3257_v23 = vld [vmem:[%s4938_s4 + $0x88] sm:$0xff] }
0x1bae   : > { %4143 = vpow2.f32 %v2647_v44  ;;  %2333 = vst.msk [vmem:[#allocation3] sm:$0xff] %vm983_vm13, %v2328_v26  ;;  %3905 = vmatprep.subr.bf16.mxu1 %v3904_v20  ;;  %v3912_v44 = vpack.c.bf16 %v3257_v23, %v3256_v22  ;;  %v3309_v23 = vld [vmem:[%s4939_s5 + $0xd] ss:$0 sm:$0xff] }
0x1baf   : > { %4145 = vpow2.f32 %v2645_v24  ;;  %3907 = vmatpush3.bf16.msra.mxu1 %v3904_v20 }
0x1bb0   : > { %3909 = vmatprep.subr.bf16.mxu1 %v3908_v43 }
0x1bb1   : > { %v2330_v60 = vpop.permute.xlu1 %2329 }
0x1bb2   : > { %2334 = vst.msk [vmem:[#allocation3 + $0x8] sm:$0xf] %vm985_vm14, %v2330_v60 }
0x1bb3   : > { %3911 = vmatpush3.bf16.msra.mxu1 %v3908_v43 }
0x1bb5   : > { %v2539_v61 = vpop.permute.xlu1 %2538 }
0x1bb6   : > { %2544 = vst.msk [vmem:[#allocation3] sm:$0xff] %vm1196_vm15, %v2539_v61 }
0x1bb8   : > { %v4144_v62 = vpop.eup %4143 }
0x1bb9   : > { %v2541_v27 = vpop.permute.xlu1 %2540  ;;  %v2652_v28 = vsel %vm662_vm7, %v4144_v62, 0.0  ;;  %v4146_v49 = vpop.eup %4145 }
0x1bba   : > { %2545 = vst.msk [vmem:[#allocation3 + $0x8] sm:$0xf] %vm1198_vm5, %v2541_v27  ;;  %2653 = vadd.xlane.f32.xlu0 %v2652_v28  ;;  %v2649_v50 = vsel %vm658_vm8, %v4146_v49, 0.0 }
0x1bbe   : > { %2650 = vadd.xlane.f32.xlu0 %v2649_v50 }
0x1bd4   : > { %4056 = vrot.lane.b32.xlu0 %v4699_v12, %s4951_s29 }
0x1bd8   : > { %4061 = vrot.lane.b32.xlu0 %v4060_v31, %s4952_s30 }
0x1c47   : > { %v2654_v33 = vpop.xlane.xlu0 %2653 }
0x1c48   : > { %4147 = vrcp.f32 %v2654_v33 }
0x1c4b   : > { %v2651_v29 = vpop.xlane.xlu0 %2650 }
0x1c4c   : > { %4149 = vrcp.f32 %v2651_v29 }
0x1c4f   : > { %v4057_v30 = vpop.permute.xlu0 %4056 }
0x1c50   : > { %v4059_v36 = vunpack.i.h.bf16 %v4057_v30  ;;  %v4058_v37 = vunpack.i.l.bf16 %v4057_v30 }
0x1c52   : > { %v3890_v39 = vpack.c.bf16 %v4059_v36, %v4058_v37  ;;  %v4148_v40 = vpop.eup %4147 }
0x1c53   : > { %v2658_v32 = vmul.f32 %v4148_v40, %v4144_v62  ;;  %v4062_v35 = vpop.permute.xlu0 %4061  ;;  %v3258_v40 = vld [vmem:[%s4938_s4 + $0x90] sm:$0xff] }
0x1c54   : > { %3892 = vmatprep.subr.msk.bf16.mxu0 %vm4437_vm11, %v3890_v39  ;;  %v4064_v42 = vunpack.i.h.bf16 %v4062_v35  ;;  %v4063_v47 = vunpack.i.l.bf16 %v4062_v35  ;;  %v3261_v35 = vld [vmem:[%s4938_s4 + $0xa8] sm:$0xff] }
0x1c55   : > { %3895 = vmatpush3.bf16.msk.msra.mxu0 %vm4437_vm11, %v3890_v39 }
0x1c56   : > { %v4150_v12 = vpop.eup %4149  ;;  %v3896_v48 = vpack.c.bf16 %v4064_v42, %v4063_v47  ;;  %v3262_v47 = vld [vmem:[%s4938_s4 + $0xb0] sm:$0xff] }
0x1c57   : > { %v2656_v41 = vmul.f32 %v4150_v12, %v4146_v49  ;;  %v3259_v12 = vld [vmem:[%s4938_s4 + $0x98] sm:$0xff] }
0x1c58   : > { %3897 = vmatprep.subr.bf16.mxu0 %v3896_v48 }
0x1c59   : > { %3640 = vmatprep.mubr.msk.f32.mxu0 %vm658_vm8, %v2656_v41  ;;  %v3916_v41 = vpack.c.bf16 %v3259_v12, %v3258_v40 }
0x1c5a   : > { %3641 = vmatmul.mubr.msk.f32.vlgmr.msra.gmra.mrb[6].mxu0 %vm658_vm8, %v2658_v32  ;;  %v3260_v32 = vld [vmem:[%s4938_s4 + $0xa0] sm:$0xff] }
0x1c5b   : > { %3899 = vmatpush3.bf16.msra.mxu0 %v3896_v48  ;;  %v3920_v42 = vpack.c.bf16 %v3261_v35, %v3260_v32  ;;  %v3263_v48 = vld [vmem:[%s4938_s4 + $0xb8] sm:$0xff] }
0x1d2d   : > { %v3642_v51 = vpop.f32.mrb[6].mxu0 }
0x1d2e   : > { %2751 = vrot.lane.b32.xlu1 %v3642_v51, %s4953_s7  ;;  %v2738_v52 = vpop.f32.mrb[7].mxu0  ;;  %v3264_v51 = vld [vmem:[%s4938_s4 + $0xc0] sm:$0xff] }
0x1d2f   : > { %2749 = vrot.lane.b32.xlu0 %v2738_v52, %s4953_s7  ;;  %v3924_v52 = vpack.c.bf16 %v3263_v48, %v3262_v47 }
0x1d32   : > { %2863 = vrot.lane.b32.xlu1 %v3305_v53, %s4172_s15 }
0x1d33   : > { %4066 = vrot.lane.b32.xlu0 %v4065_v15, %s4952_s30  ;;  %v3265_v15 = vld [vmem:[%s4938_s4 + $0xc8] sm:$0xff] }
0x1da0   : > { %v2752_v54 = vpop.permute.xlu1 %2751 }
0x1da1   : > { %2756 = vst.msk [vmem:[#allocation3 + $0x8] sm:$0xf] %vm1411_vm6, %v2752_v54  ;;  %v2750_v46 = vpop.permute.xlu0 %2749  ;;  %v3266_v54 = vld [vmem:[%s4938_s4 + $0xd0] sm:$0xff] }
0x1da2   : > { %2755 = vst.msk [vmem:[#allocation3] sm:$0xff] %vm1409_vm9, %v2750_v46  ;;  %v3267_v46 = vld [vmem:[%s4938_s4 + $0xd8] sm:$0xff] }
0x1da4   : > { %v2864_v4 = vpop.permute.xlu1 %2863 }
0x1da5   : > { %v4067_v55 = vpop.permute.xlu0 %4066 }
0x1da6   : > { %v4069_v9 = vunpack.i.h.bf16 %v4067_v55  ;;  %v4068_v10 = vunpack.i.l.bf16 %v4067_v55  ;;  %v3932_v55 = vpack.c.bf16 %v3267_v46, %v3266_v54 }
0x1da8   : > { %v3900_v45 = vpack.c.bf16 %v4069_v9, %v4068_v10  ;;  %v2758_v0 = vld [vmem:[#allocation3 + $0x8] sm:$0xf]  ;;  %v3268_v9 = vld [vmem:[%s4938_s4 + $0xe0] sm:$0xff]  ;;  %v3269_v10 = vld [vmem:[%s4938_s4 + $0xe8] sm:$0xff] }
0x1da9   : > { %v2757_v56 = vld [vmem:[#allocation3] sm:$0xff] }
0x1daa   : > { %3901 = vmatprep.subr.bf16.mxu0 %v3900_v45  ;;  %3651 = vmatprep.mubr.msk.f32.mxu0 %vm274_vm0, %v2757_v56  ;;  %v3270_v56 = vld [vmem:[%s4938_s4 + $0xf0] sm:$0xff] }
0x1dab   : > { %3903 = vmatpush3.bf16.msra.mxu0 %v3900_v45  ;;  %v3936_v45 = vpack.c.bf16 %v3269_v10, %v3268_v9 }
0x1dac   : > { %3913 = vmatprep.subr.bf16.mxu0 %v3912_v44 }
0x1dae   : > { %3652 = vmatmul.mubr.msk.f32.vlgmr.msra.gmra.mrb[8].mxu0 %vm274_vm0, %v2758_v0  ;;  %v3271_v0 = vld [vmem:[%s4938_s4 + $0xf8] sm:$0xff] }
0x1daf   : > { %3915 = vmatpush3.bf16.msra.mxu0 %v3912_v44 }
0x1db0   : > { %3917 = vmatprep.subr.bf16.mxu0 %v3916_v41 }
0x1db3   : > { %3919 = vmatpush3.bf16.msra.mxu0 %v3916_v41 }
0x1db4   : > { %3921 = vmatprep.subr.bf16.mxu0 %v3920_v42 }
0x1db7   : > { %3923 = vmatpush3.bf16.msra.mxu0 %v3920_v42 }
0x1db8   : > { %3925 = vmatprep.subr.bf16.mxu0 %v3924_v52 }
0x1dbb   : > { %3927 = vmatpush3.bf16.msra.mxu0 %v3924_v52 }
0x1e81   : > { %v3653_v1 = vpop.f32.mrb[8].mxu0 }
0x1e82   : > { %v2857_v7 = vadd.f32 %v3653_v1, %v4638_v34  ;;  %v2847_v57 = vpop.f32.mrb[9].mxu0  ;;  %v3940_v1 = vpack.c.bf16 %v3271_v0, %v3270_v56 }
0x1e83   : > { %v2856_v58 = vadd.f32 %v2847_v57, %v4640_v25 }
0x1e84   : > { %v4832_v59 = vadd.f32 %v2864_v4, %v2857_v7 }
0x1e85   : > { %v4834_v63 = vadd.f32 %v2864_v4, %v2856_v58  ;;  %v3306_v4 = vld [vmem:[%s4939_s5 + $0x9] ss:$0 sm:$0xff] }
0x1e86   : > { %v2871_v2 = vsel %vm276_vm1, %v4832_v59, 0.0 }
0x1e87   : > { %2872 = vadd.xlane.f32.xlu1 %v2871_v2  ;;  %v2868_v6 = vsel %vm274_vm0, %v4834_v63, 0.0 }
0x1e88   : > { %2869 = vadd.xlane.f32.xlu0 %v2868_v6 }
0x1e98   : > { %2899 = vrot.lane.b32.xlu1 %v3305_v53, %s4952_s30 }
0x1f14   : > { %v2873_v3 = vpop.xlane.xlu1 %2872 }
0x1f15   : > { %v2875_v5 = vmul.f32 0.03125, %v2873_v3  ;;  %v2870_v34 = vpop.xlane.xlu0 %2869 }
0x1f16   : > { %v2874_v8 = vmul.f32 0.03125, %v2870_v34 }
0x1f17   : > { %v2877_v25 = vsub.f32 %v4832_v59, %v2875_v5 }
0x1f18   : > { %v2876_v11 = vsub.f32 %v4834_v63, %v2874_v8  ;;  %v2900_v36 = vpop.permute.xlu1 %2899 }
0x1f19   : > { %v2879_v13 = vmul.f32 %v2877_v25, %v2877_v25 }
0x1f1a   : > { %v2878_v16 = vmul.f32 %v2876_v11, %v2876_v11 }
0x1f1b   : > { %v2883_v14 = vsel %vm276_vm1, %v2879_v13, 0.0 }
0x1f1c   : > { %2884 = vadd.xlane.f32.xlu0 %v2883_v14  ;;  %v2880_v17 = vsel %vm274_vm0, %v2878_v16, 0.0 }
0x1f20   : > { %2881 = vadd.xlane.f32.xlu0 %v2880_v17 }
0x1f36   : > { %2894 = vrot.lane.b32.xlu0 %v3305_v53, %s4173_s28  ;;  %v3928_v53 = vpack.c.bf16 %v3265_v15, %v3264_v51 }
0x1f38   : > { %3929 = vmatprep.subr.bf16.mxu0 %v3928_v53 }
0x1f39   : > { %3931 = vmatpush3.bf16.msra.mxu0 %v3928_v53 }
0x1f3a   : > { %3933 = vmatprep.subr.bf16.mxu0 %v3932_v55 }
0x1f3d   : > { %3935 = vmatpush3.bf16.msra.mxu0 %v3932_v55 }
0x1f3e   : > { %3937 = vmatprep.subr.bf16.mxu0 %v3936_v45 }
0x1f41   : > { %3939 = vmatpush3.bf16.msra.mxu0 %v3936_v45 }
0x1f42   : > { %3941 = vmatprep.subr.bf16.mxu0 %v3940_v1 }
0x1f45   : > { %3943 = vmatpush3.bf16.msra.mxu0 %v3940_v1 }
0x1fa9   : > { %v2885_v24 = vpop.xlane.xlu0 %2884 }
0x1faa   : > { %v2887_v26 = vmul.f32 0.03125, %v2885_v24 }
0x1fac   : > { %v2889_v60 = vadd.f32 1e-05, %v2887_v26 }
0x1fad   : > { %v2882_v61 = vpop.xlane.xlu0 %2881 }
0x1fae   : > { %4151 = vrsqrt.f32 %v2889_v60  ;;  %v2886_v62 = vmul.f32 0.03125, %v2882_v61 }
0x1fb0   : > { %v2888_v27 = vadd.f32 1e-05, %v2886_v62 }
0x1fb1   : > { %v2895_v50 = vpop.permute.xlu0 %2894 }
0x1fb2   : > { %4153 = vrsqrt.f32 %v2888_v27 }
0x1fb8   : > { %v4152_v28 = vpop.eup %4151 }
0x1fb9   : > { %v2893_v49 = vmul.f32 %v4152_v28, %v2877_v25 }
0x1fbb   : > { %v2898_v29 = vmul.f32 %v2895_v50, %v2893_v49 }
0x1fbc   : > { %v4154_v31 = vpop.eup %4153 }
0x1fbd   : > { %v2892_v33 = vmul.f32 %v4154_v31, %v2876_v11  ;;  %v2903_v39 = vadd.f32 %v2900_v36, %v2898_v29 }
0x1fbf   : > { %v2897_v30 = vmul.f32 %v2895_v50, %v2892_v33 }
0x1fc1   : > { %v2902_v37 = vadd.f32 %v2900_v36, %v2897_v30 }
0x1fc3   : > { %3662 = vmatprep.mubr.msk.f32.mxu1 %vm274_vm0, %v2902_v37 }
0x1fc4   : > { %3663 = vmatmul.mubr.msk.f32.vlgmr.msra.gmra.mrb[36].mxu1 %vm274_vm0, %v2903_v39  ;;  %v3310_v39 = vld [vmem:[%s4939_s5 + $0x2] ss:$0 sm:$0xff] }
0x2097   : > { %v3664_v7 = vpop.f32.mrb[36].mxu1 }
0x2098   : > { %v2986_v57 = vadd.f32 %v3664_v7, %v3306_v4  ;;  %v2980_v58 = vpop.f32.mrb[37].mxu1 }
0x2099   : > { %v2981_v2 = vadd.f32 %v3306_v4, %v2980_v58 }
0x209a   : > { %v2992_v6 = vmul.f32 0.044715, %v2986_v57  ;;  %v2990_v38 = vmul.f32 0.5, %v2986_v57 }
0x209b   : > { %v2991_v3 = vmul.f32 0.044715, %v2981_v2  ;;  %v2989_v20 = vmul.f32 0.5, %v2981_v2 }
0x209c   : > { %v2994_v5 = vmul.f32 %v2992_v6, %v2986_v57 }
0x209d   : > { %v2993_v34 = vmul.f32 %v2991_v3, %v2981_v2 }
0x209e   : > { %v2996_v8 = vmul.f32 %v2994_v5, %v2986_v57 }
0x209f   : > { %v2995_v25 = vmul.f32 %v2993_v34, %v2981_v2 }
0x20a0   : > { %v2998_v11 = vadd.f32 %v2996_v8, %v2986_v57 }
0x20a1   : > { %v2997_v13 = vadd.f32 %v2995_v25, %v2981_v2 }
0x20a2   : > { %v3000_v14 = vmul.f32 0.7978845, %v2998_v11 }
0x20a3   : > { %v2999_v16 = vmul.f32 0.7978845, %v2997_v13 }
0x20a4   : > { %4155 = vtanh.f32 %v3000_v14 }
0x20a5   : > { %4157 = vtanh.f32 %v2999_v16 }
0x20ae   : > { %v4156_v17 = vpop.eup %4155 }
0x20af   : > { %v4158_v18 = vpop.eup %4157  ;;  %v3004_v19 = vadd.f32 1.0, %v4156_v17 }
0x20b0   : > { %v3003_v21 = vadd.f32 1.0, %v4158_v18 }
0x20b1   : > { %v3006_v22 = vmul.f32 %v3004_v19, %v2990_v38 }
0x20b2   : > { %v3005_v43 = vmul.f32 %v3003_v21, %v2989_v20 }
0x20b4   : > { %3697 = vmatprep.mubr.f32.mxu0 %v3005_v43 }
0x20b5   : > { %3698 = vmatmul.mubr.f32.vlgmr.msra.gmra.mrb[10].mxu0 %v3006_v22 }
0x2188   : > { %v3699_v44 = vpop.f32.mrb[10].mxu0 }
0x2189   : > { %v3083_v24 = vadd.f32 %v3699_v44, %v4832_v59  ;;  %v3073_v26 = vpop.f32.mrb[11].mxu0 }
0x218a   : > { %v3082_v60 = vadd.f32 %v3073_v26, %v4834_v63 }
0x218b   : > { %v3089_v61 = vadd.f32 %v3309_v23, %v3083_v24 }
0x218c   : > { %v3088_v62 = vadd.f32 %v3309_v23, %v3082_v60 }
0x218d   : > { %v3094_v27 = vsel %vm276_vm1, %v3089_v61, 0.0 }
0x218e   : > { %3095 = vadd.xlane.f32.xlu0 %v3094_v27  ;;  %v3091_v28 = vsel %vm274_vm0, %v3088_v62, 0.0 }
0x218f   : > { %3092 = vadd.xlane.f32.xlu1 %v3091_v28 }
0x221b   : > { %v3096_v49 = vpop.xlane.xlu0 %3095 }
0x221c   : > { %v3098_v50 = vmul.f32 0.03125, %v3096_v49  ;;  %v3093_v31 = vpop.xlane.xlu1 %3092 }
0x221d   : > { %v3097_v33 = vmul.f32 0.03125, %v3093_v31 }
0x221e   : > { %v3100_v29 = vsub.f32 %v3089_v61, %v3098_v50 }
0x221f   : > { %v3099_v30 = vsub.f32 %v3088_v62, %v3097_v33 }
0x2220   : > { %v3102_v36 = vmul.f32 %v3100_v29, %v3100_v29 }
0x2221   : > { %v3101_v37 = vmul.f32 %v3099_v30, %v3099_v30 }
0x2222   : > { %v3106_v59 = vsel %vm276_vm1, %v3102_v36, 0.0 }
0x2223   : > { %3107 = vadd.xlane.f32.xlu1 %v3106_v59  ;;  %v3103_v63 = vsel %vm274_vm0, %v3101_v37, 0.0 }
0x2224   : > { %3104 = vadd.xlane.f32.xlu0 %v3103_v63 }
0x223a   : > { %3124 = vrot.lane.b32.xlu0 %v3310_v39, %s4172_s15 }
0x22b0   : > { %v3108_v40 = vpop.xlane.xlu1 %3107 }
0x22b1   : > { %v3110_v12 = vmul.f32 0.03125, %v3108_v40  ;;  %v3105_v41 = vpop.xlane.xlu0 %3104 }
0x22b2   : > { %v3109_v32 = vmul.f32 0.03125, %v3105_v41 }
0x22b3   : > { %v3112_v35 = vadd.f32 1e-05, %v3110_v12 }
0x22b4   : > { %v3111_v42 = vadd.f32 1e-05, %v3109_v32 }
0x22b5   : > { %4159 = vrsqrt.f32 %v3112_v35  ;;  %v3125_v15 = vpop.permute.xlu0 %3124 }
0x22b6   : > { %4161 = vrsqrt.f32 %v3111_v42 }
0x22bf   : > { %v4160_v47 = vpop.eup %4159 }
0x22c0   : > { %v4162_v48 = vpop.eup %4161  ;;  %v3116_v51 = vmul.f32 %v4160_v47, %v3100_v29 }
0x22c1   : > { %v3115_v52 = vmul.f32 %v4162_v48, %v3099_v30 }
0x22c2   : > { %v3122_v53 = vmul.f32 %v3310_v39, %v3116_v51 }
0x22c3   : > { %v3121_v54 = vmul.f32 %v3310_v39, %v3115_v52 }
0x22c4   : > { %v3128_v46 = vadd.f32 %v3125_v15, %v3122_v53 }
0x22c5   : > { %v3127_v55 = vadd.f32 %v3125_v15, %v3121_v54 }
0x22c6   : > { %3130 = vst.msk [vmem:[%s271_s26 + $0x8] sm:$0xf] %vm276_vm1, %v3128_v46 }
0x22c7   : > { %3129 = vst.msk [vmem:[%s271_s26] sm:$0xff] %vm274_vm0, %v3127_v55 }
0x22c8 PF: > { %s16_s21 = sadd.s32 1, %s4169_s21  }
0x22c9   : > { %p13_p4 = scmp.ge.s32.totalorder %s16_s21, 4  }
0x22cb   :  { %15 = sbr.rel (!%p13_p4) target bundleno = 1 (0x1), region = 79 }

</bundles_post_ra>
